<compile_context>
chip_gen: v7x
topology: tpu7x:2x2x1
jax: 0.10.0
libtpu: 0.0.40
codegen_flags: <defaults>
</compile_context>

<pallas_src>
import functools
import math

import jax
import jax.numpy as jnp
from jax import lax
from jax.experimental import pallas as pl
from jax.experimental.pallas import tpu as pltpu


# ----------------------------------------------------------------------------
# Kernel 1: fused qkv projection + value mix + RMS-norm + rotary (per group)
# ----------------------------------------------------------------------------
def _qkv_rope_kernel(*refs, group_heads, head_dim, scale, mix_vi):
    if mix_vi:
        (x_ref, wq_ref, wk_ref, wv_ref, vi_ref, lamb_ref,
         c_ref, s_ref, q_out, k_out, v_out) = refs
    else:
        (x_ref, wq_ref, wk_ref, wv_ref,
         c_ref, s_ref, q_out, k_out, v_out) = refs

    x = x_ref[...]                                       # (tq, D) bf16
    # Projections: bf16 operands on the MXU, f32 accumulation.  Weights are
    # pre-transposed in the wrapper so contraction is on the last axis of x.
    q = jnp.dot(x, wq_ref[...], preferred_element_type=jnp.float32)
    k = jnp.dot(x, wk_ref[...], preferred_element_type=jnp.float32)
    v = jnp.dot(x, wv_ref[...], preferred_element_type=jnp.float32)

    if mix_vi:
        lamb = lamb_ref[0]                               # SMEM scalar
        v = (1.0 - lamb) * v + lamb * vi_ref[...].astype(jnp.float32)
    # (vi=None path: PyTorch uses vi = v.clone(), so the mix is the identity
    # and we skip both the mix and the vi DMA.)
    v_out[...] = v.astype(v_out.dtype)

    c = c_ref[...]                                       # (tq, hd) = [cos, cos]
    s = s_ref[...]                                       # (tq, hd) = [sin, -sin]
    half = head_dim // 2
    eps = jnp.finfo(jnp.float32).eps

    # Per-head RMS-norm + rotary (VPU/EUP math in f32); static unroll over the
    # few heads of this group; all slices are lane-aligned (head_dim columns).
    for j in range(group_heads):
        sl = slice(j * head_dim, (j + 1) * head_dim)
        qj = q[:, sl]
        kj = k[:, sl]
        qj = qj * lax.rsqrt(jnp.mean(qj * qj, axis=-1, keepdims=True) + eps)
        kj = kj * lax.rsqrt(jnp.mean(kj * kj, axis=-1, keepdims=True) + eps)
        # half-split rotary: y = x*[cos,cos] + roll(x, hd/2)*[sin,-sin]
        # (roll by half == swap halves; uses the XLU instead of a lane concat)
        qj = qj * c + pltpu.roll(qj, shift=half, axis=1) * s
        kj = kj * c + pltpu.roll(kj, shift=half, axis=1) * s
        # fold the attention scale into q so the score tile needs no extra mul
        q_out[:, sl] = (qj * scale).astype(q_out.dtype)
        k_out[:, sl] = kj.astype(k_out.dtype)


# ----------------------------------------------------------------------------
# Kernel 2: flash attention (online softmax) with fused output projection
# ----------------------------------------------------------------------------
def _flash_attn_proj_kernel(q_ref, k_ref, v_ref, wp_ref, y_ref,
                            m_sc, l_sc, acc_sc,
                            *, group_heads, head_dim, tq, tk):
    qi = pl.program_id(0)
    g = pl.program_id(1)
    ki = pl.program_id(2)
    n_kv = pl.num_programs(2)

    @pl.when((g == 0) & (ki == 0))
    def _init_out():
        y_ref[...] = jnp.zeros_like(y_ref)

    @pl.when(ki == 0)
    def _init_stats():
        m_sc[...] = jnp.full_like(m_sc, -jnp.inf)
        l_sc[...] = jnp.zeros_like(l_sc)
        acc_sc[...] = jnp.zeros_like(acc_sc)

    # Skip kv tiles that are entirely above the causal diagonal (~2x fewer
    # score FLOPs).
    @pl.when(ki * tk <= qi * tq + (tq - 1))
    def _compute():
        row = qi * tq + lax.broadcasted_iota(jnp.int32, (tq, tk), 0)
        col = ki * tk + lax.broadcasted_iota(jnp.int32, (tq, tk), 1)
        causal = row >= col
        for j in range(group_heads):                     # static unroll
            sl = slice(j * head_dim, (j + 1) * head_dim)
            qj = q_ref[:, sl]                            # (tq, hd) bf16 (pre-scaled)
            kj = k_ref[:, sl]                            # (tk, hd) bf16
            vj = v_ref[:, sl]                            # (tk, hd) bf16
            # q @ k^T without materializing a transpose: contract last axes.
            s = lax.dot_general(qj, kj, (((1,), (1,)), ((), ())),
                                preferred_element_type=jnp.float32)
            s = jnp.where(causal, s, -jnp.inf)
            m_prev = m_sc[j]                             # (tq, 1)
            m_new = jnp.maximum(m_prev, jnp.max(s, axis=-1, keepdims=True))
            alpha = jnp.exp(m_prev - m_new)
            p = jnp.exp(s - m_new)
            l_sc[j] = alpha * l_sc[j] + jnp.sum(p, axis=-1, keepdims=True)
            acc_sc[j] = alpha * acc_sc[j] + jnp.dot(
                p.astype(vj.dtype), vj, preferred_element_type=jnp.float32)
            m_sc[j] = m_new

    # Epilogue: normalize this group's heads and accumulate the fused c_proj
    # contribution into the resident (tq, D) output block.
    @pl.when(ki == n_kv - 1)
    def _finalize():
        for j in range(group_heads):
            o_j = (acc_sc[j] * pl.reciprocal(l_sc[j], approx=True)
                   ).astype(jnp.bfloat16)                # (tq, hd)
            row0 = pl.multiple_of((g * group_heads + j) * head_dim, head_dim)
            w_j = wp_ref[pl.ds(row0, head_dim), :]       # (hd, D) bf16
            y_ref[...] += jnp.dot(o_j, w_j, preferred_element_type=jnp.float32)


# ----------------------------------------------------------------------------
# Wrapper
# ----------------------------------------------------------------------------
def _pick_heads_per_group(n_head, hd):
    """Smallest divisor G of n_head with lane-aligned group width G*hd
    (prefer >=256 for the v6e/v7x MXU); fall back to all heads (width == D)."""
    divisors = [g for g in range(1, n_head + 1) if n_head % g == 0]
    aligned = [g for g in divisors if (g * hd) % 128 == 0]
    if not aligned:
        return n_head
    for g in aligned:
        if g * hd >= 256:
            return g
    return aligned[-1]


def causal_self_attention(x, wq, wk, wv, wproj, lamb, n_head, vi=None,
                          *, tq=128, tk=128, heads_per_group=None):
    """Pallas implementation of CausalSelfAttention.forward (causal mask)."""
    B, C, T, D = x.shape
    assert B == 1 and C == 1, "Must use batch size = 1 (FlexAttention path)"
    assert D % n_head == 0
    hd = D // n_head
    assert hd % 2 == 0

    tq = min(tq, T)
    tk = min(tk, T)
    assert T % tq == 0 and T % tk == 0, "T must be divisible by tile sizes"

    G = heads_per_group if heads_per_group is not None else _pick_heads_per_group(n_head, hd)
    assert n_head % G == 0
    n_groups = n_head // G
    gw = G * hd
    assert gw % 128 == 0 or gw == D, "group width must be lane-aligned (or == D)"

    scale = 1.0 / math.sqrt(hd)
    mix_vi = vi is not None

    # bf16 MXU operands (halves HBM<->VMEM traffic); weights pre-transposed so
    # kernels never transpose a VMEM tile.
    x2d = x.reshape(T, D).astype(jnp.bfloat16)
    wqT = jnp.asarray(wq, jnp.float32).T.astype(jnp.bfloat16)    # (D, D)
    wkT = jnp.asarray(wk, jnp.float32).T.astype(jnp.bfloat16)
    wvT = jnp.asarray(wv, jnp.float32).T.astype(jnp.bfloat16)
    wpT = jnp.asarray(wproj, jnp.float32).T.astype(jnp.bfloat16)

    # Rotary tables, pre-folded so the kernel needs no concatenate:
    #   y = x * [cos, cos] + roll(x, hd/2) * [sin, -sin]
    inv_freq = (1.0 / 10000.0) ** (jnp.arange(0, hd, 2, dtype=jnp.float32) / hd)
    freqs = jnp.outer(jnp.arange(T, dtype=jnp.float32), inv_freq)   # (T, hd/2)
    cos, sin = jnp.cos(freqs), jnp.sin(freqs)
    rope_c = jnp.concatenate([cos, cos], axis=-1)                   # (T, hd)
    rope_s = jnp.concatenate([sin, -sin], axis=-1)                  # (T, hd)

    n_tq, n_tk = T // tq, T // tk

    # ---- kernel 1: qkv projection + value mix + RMS-norm + rotary ----------
    qkv_inputs = [x2d, wqT, wkT, wvT]
    in_specs = [
        pl.BlockSpec((tq, D), lambda g, i: (i, 0)),     # x tokens
        pl.BlockSpec((D, gw), lambda g, i: (0, g)),     # Wq^T columns of group
        pl.BlockSpec((D, gw), lambda g, i: (0, g)),     # Wk^T
        pl.BlockSpec((D, gw), lambda g, i: (0, g)),     # Wv^T
    ]
    if mix_vi:
        vi2d = jnp.asarray(vi, jnp.float32).reshape(T, D).astype(jnp.bfloat16)
        lamb_arr = jnp.reshape(jnp.asarray(lamb, jnp.float32), (1,))
        qkv_inputs += [vi2d, lamb_arr]
        in_specs += [
            pl.BlockSpec((tq, gw), lambda g, i: (i, g)),                     # vi
            pl.BlockSpec(memory_space=pltpu.MemorySpace.SMEM),               # lamb
        ]
    qkv_inputs += [rope_c, rope_s]
    in_specs += [
        pl.BlockSpec((tq, hd), lambda g, i: (i, 0)),    # rope cos table
        pl.BlockSpec((tq, hd), lambda g, i: (i, 0)),    # rope sin table
    ]
    out_blk = pl.BlockSpec((tq, gw), lambda g, i: (i, g))

    q2d, k2d, v2d = pl.pallas_call(
        functools.partial(_qkv_rope_kernel, group_heads=G, head_dim=hd,
                          scale=scale, mix_vi=mix_vi),
        grid=(n_groups, n_tq),
        in_specs=in_specs,
        out_specs=[out_blk, out_blk, out_blk],
        out_shape=[jax.ShapeDtypeStruct((T, D), jnp.bfloat16)] * 3,
        compiler_params=pltpu.CompilerParams(
            dimension_semantics=("parallel", "arbitrary")),
    )(*qkv_inputs)

    # ---- kernel 2: flash attention + fused c_proj ---------------------------
    y2d = pl.pallas_call(
        functools.partial(_flash_attn_proj_kernel, group_heads=G, head_dim=hd,
                          tq=tq, tk=tk),
        grid=(n_tq, n_groups, n_tk),
        in_specs=[
            pl.BlockSpec((tq, gw), lambda qi, g, ki: (qi, g)),   # Q (group cols)
            pl.BlockSpec((tk, gw), lambda qi, g, ki: (ki, g)),   # K
            pl.BlockSpec((tk, gw), lambda qi, g, ki: (ki, g)),   # V
            pl.BlockSpec((D, D), lambda qi, g, ki: (0, 0)),      # Wproj^T (resident)
        ],
        out_specs=pl.BlockSpec((tq, D), lambda qi, g, ki: (qi, 0)),
        out_shape=jax.ShapeDtypeStruct((T, D), jnp.float32),
        scratch_shapes=[
            pltpu.VMEM((G, tq, 1), jnp.float32),     # running max
            pltpu.VMEM((G, tq, 1), jnp.float32),     # running denom
            pltpu.VMEM((G, tq, hd), jnp.float32),    # running numerator
        ],
        compiler_params=pltpu.CompilerParams(
            dimension_semantics=("parallel", "arbitrary", "arbitrary")),
    )(q2d, k2d, v2d, wpT)

    return y2d.reshape(B, C, T, D)


# ----------------------------------------------------------------------------
# Pure-JAX reference mirroring the PyTorch forward (causal mask), f32.
# ----------------------------------------------------------------------------
def _reference(x, wq, wk, wv, wproj, lamb, n_head, vi=None):
    B, C, T, D = x.shape
    hd = D // n_head
    x2d = x.reshape(T, D).astype(jnp.float32)
    q = (x2d @ wq.T).reshape(T, n_head, hd)
    k = (x2d @ wk.T).reshape(T, n_head, hd)
    v = (x2d @ wv.T).reshape(T, n_head, hd)
    vi_r = v if vi is None else vi.reshape(T, n_head, hd).astype(jnp.float32)
    v = (1.0 - lamb) * v + lamb * vi_r

    eps = jnp.finfo(jnp.float32).eps
    rms = lambda z: z * lax.rsqrt(jnp.mean(z * z, -1, keepdims=True) + eps)
    q, k = rms(q), rms(k)

    inv_freq = (1.0 / 10000.0) ** (jnp.arange(0, hd, 2, dtype=jnp.float32) / hd)
    freqs = jnp.outer(jnp.arange(T, dtype=jnp.float32), inv_freq)
    cos = jnp.cos(freqs)[:, None, :]
    sin = jnp.sin(freqs)[:, None, :]

    def rope(z):
        z1, z2 = z[..., :hd // 2], z[..., hd // 2:]
        return jnp.concatenate([z1 * cos + z2 * sin, -z1 * sin + z2 * cos], -1)

    q, k = rope(q), rope(k)

    qh, kh, vh = (jnp.transpose(a, (1, 0, 2)) for a in (q, k, v))
    s = jnp.einsum("htd,hsd->hts", qh, kh) / math.sqrt(hd)
    mask = jnp.tril(jnp.ones((T, T), bool))
    s = jnp.where(mask, s, -jnp.inf)
    p = jax.nn.softmax(s, axis=-1)
    o = jnp.einsum("hts,hsd->htd", p, vh)
    y2d = jnp.transpose(o, (1, 0, 2)).reshape(T, D) @ wproj.T
    return y2d.reshape(B, C, T, D)


def _rel_err(a, b):
    a = jnp.asarray(a, jnp.float32).ravel()
    b = jnp.asarray(b, jnp.float32).ravel()
    return float(jnp.linalg.norm(a - b) / (jnp.linalg.norm(b) + 1e-12))


if __name__ == "__main__":
    # Small but lane-dense shapes: head_dim=128 so per-head blocks fill the
    # 128-lane axis; T=32 with 16-wide tiles exercises multi-tile online
    # softmax and the causal block-skip path.
    B, T, D, N_HEAD = 1, 32, 256, 2
    HD = D // N_HEAD

    key = jax.random.PRNGKey(0)
    kx, kq, kk, kv, kp, kvi = jax.random.split(key, 6)

    x = jax.random.normal(kx, (B, 1, T, D), jnp.float32)
    wq = jax.random.normal(kq, (D, D), jnp.float32) * (1.0 / math.sqrt(D))
    wk = jax.random.normal(kk, (D, D), jnp.float32) * (1.0 / math.sqrt(D))
    wv = jax.random.normal(kv, (D, D), jnp.float32) * (1.0 / math.sqrt(D))
    wproj = jax.random.normal(kp, (D, D), jnp.float32) * math.sqrt(2.0 / (D + D))
    lamb = 0.5
    vi = jax.random.normal(kvi, (B, T, N_HEAD, HD), jnp.float32)

    # vi provided; 1 head per group -> exercises multi-group c_proj accumulation
    y = causal_self_attention(x, wq, wk, wv, wproj, lamb, N_HEAD, vi=vi,
                              tq=16, tk=16, heads_per_group=1)
    y = jax.block_until_ready(y)
    y_ref = _reference(x, wq, wk, wv, wproj, lamb, N_HEAD, vi=vi)
    assert y.shape == x.shape
    assert not bool(jnp.any(jnp.isnan(y))), "NaN in kernel output"
    err = _rel_err(y, y_ref)
    assert err < 3e-2, f"mismatch vs reference (rel err {err})"

    # vi=None path (skips value mix + vi DMA); default head grouping (G=2).
    y2 = jax.block_until_ready(
        causal_self_attention(x, wq, wk, wv, wproj, lamb, N_HEAD, vi=None,
                              tq=16, tk=16))
    y2_ref = _reference(x, wq, wk, wv, wproj, lamb, N_HEAD, vi=None)
    err2 = _rel_err(y2, y2_ref)
    assert err2 < 3e-2, f"mismatch vs reference, vi=None (rel err {err2})"

    print("KERNEL_OK")
</pallas_src>

<mosaic_0001>
module attributes {stable_mosaic.version = 11 : i64} {
  func.func @_qkv_rope_kernel(%arg0: i32, %arg1: i32, %arg2: memref<16x256xbf16, #tpu.memory_space<vmem>>, %arg3: memref<256x128xbf16, #tpu.memory_space<vmem>>, %arg4: memref<256x128xbf16, #tpu.memory_space<vmem>>, %arg5: memref<256x128xbf16, #tpu.memory_space<vmem>>, %arg6: memref<16x128xbf16, #tpu.memory_space<vmem>>, %arg7: memref<1xf32, #tpu.memory_space<smem>>, %arg8: memref<16x128xf32, #tpu.memory_space<vmem>>, %arg9: memref<16x128xf32, #tpu.memory_space<vmem>>, %arg10: memref<16x128xbf16, #tpu.memory_space<vmem>>, %arg11: memref<16x128xbf16, #tpu.memory_space<vmem>>, %arg12: memref<16x128xbf16, #tpu.memory_space<vmem>>) attributes {dimension_semantics = [#tpu.dimension_semantics<parallel>, #tpu.dimension_semantics<arbitrary>], iteration_bounds = array<i64: 2, 2>, scalar_prefetch = 0 : i64, scratch_operands = 0 : i64, tpu.core_type = #tpu.core_type<tc>, window_params = [{transform_indices = @transform_0, window_bounds = array<i64: 16, 256>}, {transform_indices = @transform_1, window_bounds = array<i64: 256, 128>}, {transform_indices = @transform_2, window_bounds = array<i64: 256, 128>}, {transform_indices = @transform_3, window_bounds = array<i64: 256, 128>}, {transform_indices = @transform_4, window_bounds = array<i64: 16, 128>}, {transform_indices = @transform_5, window_bounds = array<i64: 1>}, {transform_indices = @transform_6, window_bounds = array<i64: 16, 128>}, {transform_indices = @transform_7, window_bounds = array<i64: 16, 128>}, {transform_indices = @transform_8, window_bounds = array<i64: 16, 128>}, {transform_indices = @transform_9, window_bounds = array<i64: 16, 128>}, {transform_indices = @transform_10, window_bounds = array<i64: 16, 128>}]} {
    %c0 = arith.constant 0 : index
    %c0_0 = arith.constant 0 : index
    %0 = vector.load %arg2[%c0, %c0_0] : memref<16x256xbf16, #tpu.memory_space<vmem>>, vector<16x256xbf16>
    %c0_1 = arith.constant 0 : index
    %c0_2 = arith.constant 0 : index
    %1 = vector.load %arg3[%c0_1, %c0_2] : memref<256x128xbf16, #tpu.memory_space<vmem>>, vector<256x128xbf16>
    %cst = arith.constant dense<0.000000e+00> : vector<16x128xf32>
    %2 = tpu.matmul %0, %1, %cst {dimension_numbers = #tpu.dot_dimension_numbers<[1], [0], [0], [1], [0, 0, 1, 1], [], []>} : vector<16x256xbf16>, vector<256x128xbf16>, vector<16x128xf32> -> vector<16x128xf32>
    %c0_3 = arith.constant 0 : index
    %c0_4 = arith.constant 0 : index
    %3 = vector.load %arg4[%c0_3, %c0_4] : memref<256x128xbf16, #tpu.memory_space<vmem>>, vector<256x128xbf16>
    %cst_5 = arith.constant dense<0.000000e+00> : vector<16x128xf32>
    %4 = tpu.matmul %0, %3, %cst_5 {dimension_numbers = #tpu.dot_dimension_numbers<[1], [0], [0], [1], [0, 0, 1, 1], [], []>} : vector<16x256xbf16>, vector<256x128xbf16>, vector<16x128xf32> -> vector<16x128xf32>
    %c0_6 = arith.constant 0 : index
    %c0_7 = arith.constant 0 : index
    %5 = vector.load %arg5[%c0_6, %c0_7] : memref<256x128xbf16, #tpu.memory_space<vmem>>, vector<256x128xbf16>
    %cst_8 = arith.constant dense<0.000000e+00> : vector<16x128xf32>
    %6 = tpu.matmul %0, %5, %cst_8 {dimension_numbers = #tpu.dot_dimension_numbers<[1], [0], [0], [1], [0, 0, 1, 1], [], []>} : vector<16x256xbf16>, vector<256x128xbf16>, vector<16x128xf32> -> vector<16x128xf32>
    %c0_9 = arith.constant 0 : index
    %7 = memref.load %arg7[%c0_9] : memref<1xf32, #tpu.memory_space<smem>>
    %cst_10 = arith.constant 1.000000e+00 : f32
    %8 = arith.subf %cst_10, %7 : f32
    %9 = vector.broadcast %8 : f32 to vector<16x128xf32>
    %10 = arith.mulf %9, %6 : vector<16x128xf32>
    %c0_11 = arith.constant 0 : index
    %c0_12 = arith.constant 0 : index
    %11 = vector.load %arg6[%c0_11, %c0_12] : memref<16x128xbf16, #tpu.memory_space<vmem>>, vector<16x128xbf16>
    %12 = arith.extf %11 : vector<16x128xbf16> to vector<16x128xf32>
    %13 = vector.broadcast %7 : f32 to vector<16x128xf32>
    %14 = arith.mulf %13, %12 : vector<16x128xf32>
    %15 = arith.addf %10, %14 : vector<16x128xf32>
    %16 = arith.truncf %15 : vector<16x128xf32> to vector<16x128xbf16>
    %c0_13 = arith.constant 0 : index
    %c0_14 = arith.constant 0 : index
    %17 = vector.load %arg12[%c0_13, %c0_14] : memref<16x128xbf16, #tpu.memory_space<vmem>>, vector<16x128xbf16>
    tpu.vector_store %arg12[%c0_13, %c0_14], %16 {strides = array<i32>} : memref<16x128xbf16, #tpu.memory_space<vmem>>, vector<16x128xbf16>,
    %c0_15 = arith.constant 0 : index
    %c0_16 = arith.constant 0 : index
    %18 = vector.load %arg8[%c0_15, %c0_16] : memref<16x128xf32, #tpu.memory_space<vmem>>, vector<16x128xf32>
    %c0_17 = arith.constant 0 : index
    %c0_18 = arith.constant 0 : index
    %19 = vector.load %arg9[%c0_17, %c0_18] : memref<16x128xf32, #tpu.memory_space<vmem>>, vector<16x128xf32>
    %20 = arith.mulf %2, %2 : vector<16x128xf32>
    %cst_19 = arith.constant dense<0.000000e+00> : vector<16xf32>
    %21 = vector.multi_reduction <add>, %20, %cst_19 [1] : vector<16x128xf32> to vector<16xf32>
    %22 = vector.shape_cast %21 : vector<16xf32> to vector<16x1xf32>
    %cst_20 = arith.constant 1.280000e+02 : f32
    %23 = vector.broadcast %cst_20 : f32 to vector<16x1xf32>
    %24 = arith.divf %22, %23 : vector<16x1xf32>
    %cst_21 = arith.constant 1.1920929E-7 : f32
    %25 = vector.broadcast %cst_21 : f32 to vector<16x1xf32>
    %26 = arith.addf %24, %25 : vector<16x1xf32>
    %27 = math.rsqrt %26 : vector<16x1xf32>
    %28 = vector.broadcast %27 : vector<16x1xf32> to vector<16x128xf32>
    %29 = arith.mulf %2, %28 : vector<16x128xf32>
    %30 = arith.mulf %4, %4 : vector<16x128xf32>
    %cst_22 = arith.constant dense<0.000000e+00> : vector<16xf32>
    %31 = vector.multi_reduction <add>, %30, %cst_22 [1] : vector<16x128xf32> to vector<16xf32>
    %32 = vector.shape_cast %31 : vector<16xf32> to vector<16x1xf32>
    %cst_23 = arith.constant 1.280000e+02 : f32
    %33 = vector.broadcast %cst_23 : f32 to vector<16x1xf32>
    %34 = arith.divf %32, %33 : vector<16x1xf32>
    %cst_24 = arith.constant 1.1920929E-7 : f32
    %35 = vector.broadcast %cst_24 : f32 to vector<16x1xf32>
    %36 = arith.addf %34, %35 : vector<16x1xf32>
    %37 = math.rsqrt %36 : vector<16x1xf32>
    %38 = vector.broadcast %37 : vector<16x1xf32> to vector<16x128xf32>
    %39 = arith.mulf %4, %38 : vector<16x128xf32>
    %40 = arith.mulf %29, %18 : vector<16x128xf32>
    %c64_i32 = arith.constant 64 : i32
    %41 = tpu.dynamic_rotate %29 by %c64_i32 dim 1 : vector<16x128xf32>, i32 -> vector<16x128xf32>
    %42 = arith.mulf %41, %19 : vector<16x128xf32>
    %43 = arith.addf %40, %42 : vector<16x128xf32>
    %44 = arith.mulf %39, %18 : vector<16x128xf32>
    %c64_i32_25 = arith.constant 64 : i32
    %45 = tpu.dynamic_rotate %39 by %c64_i32_25 dim 1 : vector<16x128xf32>, i32 -> vector<16x128xf32>
    %46 = arith.mulf %45, %19 : vector<16x128xf32>
    %47 = arith.addf %44, %46 : vector<16x128xf32>
    %cst_26 = arith.constant 0.0883883461 : f32
    %48 = vector.broadcast %cst_26 : f32 to vector<16x128xf32>
    %49 = arith.mulf %43, %48 : vector<16x128xf32>
    %50 = arith.truncf %49 : vector<16x128xf32> to vector<16x128xbf16>
    %c0_27 = arith.constant 0 : index
    %c0_28 = arith.constant 0 : index
    %51 = vector.load %arg10[%c0_27, %c0_28] : memref<16x128xbf16, #tpu.memory_space<vmem>>, vector<16x128xbf16>
    tpu.vector_store %arg10[%c0_27, %c0_28], %50 {strides = array<i32>} : memref<16x128xbf16, #tpu.memory_space<vmem>>, vector<16x128xbf16>,
    %52 = arith.truncf %47 : vector<16x128xf32> to vector<16x128xbf16>
    %c0_29 = arith.constant 0 : index
    %c0_30 = arith.constant 0 : index
    %53 = vector.load %arg11[%c0_29, %c0_30] : memref<16x128xbf16, #tpu.memory_space<vmem>>, vector<16x128xbf16>
    tpu.vector_store %arg11[%c0_29, %c0_30], %52 {strides = array<i32>} : memref<16x128xbf16, #tpu.memory_space<vmem>>, vector<16x128xbf16>,
    return
  }
  func.func @transform_0(%arg0: i32, %arg1: i32) -> (i32, i32) {
    %c0_i32 = arith.constant 0 : i32
    %c0_i32_0 = arith.constant 0 : i32
    return %arg1, %c0_i32 : i32, i32
  }
  func.func @transform_1(%arg0: i32, %arg1: i32) -> (i32, i32) {
    %c0_i32 = arith.constant 0 : i32
    %c0_i32_0 = arith.constant 0 : i32
    return %c0_i32, %arg0 : i32, i32
  }
  func.func @transform_2(%arg0: i32, %arg1: i32) -> (i32, i32) {
    %c0_i32 = arith.constant 0 : i32
    %c0_i32_0 = arith.constant 0 : i32
    return %c0_i32, %arg0 : i32, i32
  }
  func.func @transform_3(%arg0: i32, %arg1: i32) -> (i32, i32) {
    %c0_i32 = arith.constant 0 : i32
    %c0_i32_0 = arith.constant 0 : i32
    return %c0_i32, %arg0 : i32, i32
  }
  func.func @transform_4(%arg0: i32, %arg1: i32) -> (i32, i32) {
    %c0_i32 = arith.constant 0 : i32
    return %arg1, %arg0 : i32, i32
  }
  func.func @transform_5(%arg0: i32, %arg1: i32) -> i32 {
    %c0_i32 = arith.constant 0 : i32
    %c0_i32_0 = arith.constant 0 : i32
    return %c0_i32 : i32
  }
  func.func @transform_6(%arg0: i32, %arg1: i32) -> (i32, i32) {
    %c0_i32 = arith.constant 0 : i32
    %c0_i32_0 = arith.constant 0 : i32
    return %arg1, %c0_i32 : i32, i32
  }
  func.func @transform_7(%arg0: i32, %arg1: i32) -> (i32, i32) {
    %c0_i32 = arith.constant 0 : i32
    %c0_i32_0 = arith.constant 0 : i32
    return %arg1, %c0_i32 : i32, i32
  }
  func.func @transform_8(%arg0: i32, %arg1: i32) -> (i32, i32) {
    %c0_i32 = arith.constant 0 : i32
    return %arg1, %arg0 : i32, i32
  }
  func.func @transform_9(%arg0: i32, %arg1: i32) -> (i32, i32) {
    %c0_i32 = arith.constant 0 : i32
    return %arg1, %arg0 : i32, i32
  }
  func.func @transform_10(%arg0: i32, %arg1: i32) -> (i32, i32) {
    %c0_i32 = arith.constant 0 : i32
    return %arg1, %arg0 : i32, i32
  }
}

</mosaic_0001>

<bundles_post_ra>
// kernel: tpu_custom_call.1
= control target key start
LH: loop header
LB: loop body
LE: loop exit
PB: predicated region body
PF: predicated region fallthrough
CT: control target
= control target key end

     0   :  { %s3311_s0 = inlined_call_operand.hbm [shape: bf16[32,256], index: 0, kind: input, shape index: {}]   ;;  %s3312_s1 = inlined_call_operand.hbm [shape: bf16[256,256], index: 1, kind: input, shape index: {}]   ;;  %s3313_s2 = inlined_call_operand.hbm [shape: bf16[256,256], index: 2, kind: input, shape index: {}]   ;;  %s3314_s3 = inlined_call_operand.hbm [shape: bf16[256,256], index: 3, kind: input, shape index: {}]   ;;  %s3315_s4 = inlined_call_operand.hbm [shape: bf16[32,256], index: 4, kind: input, shape index: {}]   ;;  %s3316_s5 = inlined_call_operand.<no memory space> [shape: f32[1], index: 5, kind: input, shape index: {}]   ;;  %s3317_s6 = inlined_call_operand.hbm [shape: f32[32,128], index: 6, kind: input, shape index: {}]   ;;  %s3318_s7 = inlined_call_operand.hbm [shape: f32[32,128], index: 7, kind: input, shape index: {}]   ;;  %s3319_s8 = inlined_call_operand.hbm [shape: bf16[32,256], index: 8, kind: output, shape index: {0}]   ;;  %s3320_s9 = inlined_call_operand.hbm [shape: bf16[32,256], index: 9, kind: output, shape index: {1}]   ;;  %s3321_s10 = inlined_call_operand.hbm [shape: bf16[32,256], index: 10, kind: output, shape index: {2}]  }
   0x1   :  { %3364 = sst [smem:[#allocation41_spill]] %s3311_s0 }
   0x2   :  { %3365 = sst [smem:[#allocation42_spill]] %s3312_s1 }
   0x3   :  { %3366 = sst [smem:[#allocation43_spill]] %s3313_s2 }
   0x4   :  { %3367 = sst [smem:[#allocation44_spill]] %s3314_s3 }
   0x5   :  { %3368 = sst [smem:[#allocation45_spill]] %s3315_s4 }
   0x6   :  { %3369 = sst [smem:[#allocation46_spill]] %s3317_s6 }
   0x7   :  { %3370 = sst [smem:[#allocation47_spill]] %s3318_s7 }
   0x8   :  { %3371 = sst [smem:[#allocation48_spill]] %s3319_s8 }
   0x9   :  { %3372 = sst [smem:[#allocation49_spill]] %s3320_s9 }
   0xa   :  { %3373 = sst [smem:[#allocation50_spill]] %s3321_s10 }
   0xb   :  { %16 = sst [smem:[#allocation2]] %s3316_s5 }
   0xc   :  { %17 = vsyncpa [#allocation4], 0 }
   0xd   :  { %19 = vsyncpa [#allocation4 + $0x1], 0 }
   0xe   :  { %20 = vsyncpa [#allocation7], 0 }
   0xf   :  { %22 = vsyncpa [#allocation7 + $0x1], 0 }
  0x10   :  { %23 = vsyncpa [#allocation10], 0 }
  0x11   :  { %25 = vsyncpa [#allocation10 + $0x1], 0 }
  0x12   :  { %26 = vsyncpa [#allocation13], 0 }
  0x13   :  { %28 = vsyncpa [#allocation13 + $0x1], 0 }
  0x14   :  { %29 = vsyncpa [#allocation5], 0 }
  0x15   :  { %31 = vsyncpa [#allocation5 + $0x1], 0 }
  0x16   :  { %32 = vsyncpa [#allocation17], 0 }
  0x17   :  { %34 = vsyncpa [#allocation17 + $0x1], 0  ;;  %s2563_s15 = smov 0   ;;  %s2565_s16 = smov 0  }
  0x18   :  { %s2567_s17 = smov 0   ;;  %s2569_s18 = smov 0  }
  0x19   :  { %s2571_s5 = smov 0   ;;  %s2573_s19 = smov 0  }
  0x1a   :  { %s2575_s20 = smov 0   ;;  %s2577_s21 = smov 0  }
  0x1b   :  { %s2579_s22 = smov 0   ;;  %s2581_s23 = smov 0  }
  0x1c   :  { %s2583_s24 = smov 0   ;;  %s2585_s25 = smov 0  }
  0x1d   :  { %s2587_s26 = smov 0   ;;  %s2589_s27 = smov 0  }
  0x1e LB: > { %3374 = sst [smem:[#allocation26_spill]] %s2434_s15  ;;  %s2632_s28 = sadd.s32 4294967295, %s2486_s27   ;;  %s2486_s27 = sphi %s2589_s27, %s40_s27   ;;  %s2482_s26 = sphi %s2587_s26, %s3465_s26   ;;  %s2478_s25 = sphi %s2585_s25, %s3474_s25   ;;  %s2474_s24 = sphi %s2583_s24, %s3463_s24   ;;  %s2470_s23 = sphi %s2581_s23, %s3462_s23   ;;  %s2466_s22 = sphi %s2579_s22, %s3473_s22   ;;  %s2462_s21 = sphi %s2577_s21, %s3472_s21   ;;  %s2458_s20 = sphi %s2575_s20, %s3460_s20   ;;  %s2454_s19 = sphi %s2573_s19, %s3471_s19   ;;  %s2450_s5 = sphi %s2571_s5, %s3458_s5   ;;  %s2446_s18 = sphi %s2569_s18, %s3470_s18   ;;  %s2442_s17 = sphi %s2567_s17, %s3469_s17   ;;  %s2438_s16 = sphi %s2565_s16, %s3468_s16   ;;  %s2434_s15 = sphi %s2563_s15, %s3467_s15  }
  0x1f   : > { %3375 = sst [smem:[#allocation27_spill]] %s2450_s5  ;;  %p3331_p0 = scmp.eq.s32.totalorder %s2486_s27, 0 }
  0x20   : > { %3376 = sst [smem:[#allocation28_spill]] %s2454_s19  ;;  %p3330_p1 = scmp.eq.s32.totalorder %s2632_s28, 0 }
  0x21   : > { %3377 = sst [smem:[#allocation29_spill]] %s2462_s21  ;;  %p92_p2 = scmp.ne.s32.totalorder %s2454_s19, %s2450_s5 }
  0x22   : > { %3378 = sst [smem:[#allocation30_spill]] %s2470_s23  ;;  %p98_p3 = scmp.ne.s32.totalorder %s2450_s5, %s2446_s18 }
  0x23   : > { %3379 = sst [smem:[#allocation31_spill]] %s2474_s24  ;;  %p3329_p4 = scmp.lt.s32.totalorder %s2486_s27, 4 }
  0x24   : > { %3380 = sst [smem:[#allocation32_spill]] %s2478_s25  ;;  %p94_p5 = por %p92_p2, %p3331_p0 }
  0x25   : > { %3381 = sst [smem:[#allocation33_spill]] %s2482_s26  ;;  %p2645_p6 = por %p98_p3, %p3330_p1 }
  0x26   : > { %s2650_s11 = sand.u32 1, %s2486_s27   ;;  %s386_s12 = sand.u32 1, %s2454_s19  }
  0x27   : > { %s3382_s30 = scalar_select %p2645_p6, 1, 0 }
  0x28   : > { %s2653_s13 = sshll.u32 %s386_s12, 7  ;;  %s2656_s14 = sshll.u32 %s2482_s26, 6 }
  0x29   : > { %3383 = sst [smem:[#allocation34_spill]] %s3382_s30  ;;  %s3384_s1 = sld [smem:[#allocation42_spill]] }
  0x2a   : > { %s388_s9 = scalar_lea.vmem [#allocation6], %s2653_s13  ;;  %p2667_p7 = pnand %p3329_p4, %p94_p5 }
  0x2b   : > { %s394_s8 = sshll.u32 %s388_s9, 4  ;;  %s2671_s8 = int_to_ptr.vmem [resolvable:$true] %s394_s8 }
  0x2c   : > { %s3385_s24 = scalar_select %p2667_p7, 1, 0 }
  0x2d   : > { %p2678_p9 = pneg %p2667_p7 }
  0x2f   : > { %s2662_s10 = scalar_lea.hbm %s3384_s1, %s2656_s14  ;;  %s2059_s30 = scalar_lea.hbm %s3384_s1, 4096 }
  0x30   : > { %s2054_s23 = scalar_lea.hbm %s2662_s10, 2048  ;;  %p2060_p12 = scmp.lt.u32.totalorder %s2662_s10, %s3384_s1 }
  0x31   : > { %p2055_p8 = scmp.ne.s32.totalorder %s2662_s10, %s2054_s23  ;;  %p2061_p13 = scmp.lt.u32.totalorder %s2059_s30, %s2054_s23 }
  0x32   : > { %s3386_s29 = scalar_select %p2678_p9, 1, 0 }
  0x33   : > { %p2057_p10 = pnand %p2678_p9, %p2055_p8  ;;  %p2062_p2 = por %p2061_p13, %p2060_p12 }
  0x34   : > { %p2063_p3 = scmp.lt.u32.totalorder %s2054_s23, %s2662_s10 }
  0x35   : > { %p2058_p11 = pneg %p2057_p10 }
  0x36   : > { %p2064_p5 = por %p2063_p3, %p2062_p2 }
  0x38   : > { %p2065_p4 = pnand %p2064_p5, %p2058_p11 }
  0x3a   : > { %2068 = shalt.err (!%p2065_p4)
}
  0x3b   : > { %s2069_s12 = scalar_lea.vmem %s2671_s8, 2048  ;;  %s2488_s9 = smov [#allocation6]  }
  0x3c   : > { %p2070_p8 = scmp.ne.s32.totalorder %s2671_s8, %s2069_s12  ;;  %s2074_s18 = sshll.u32 %s2488_s9, 4  ;;  %s2075_s18 = int_to_ptr.vmem [resolvable:$false] %s2074_s18 }
  0x3d   : > { %s2076_s7 = scalar_lea.vmem %s2075_s18, 4096  ;;  %p2077_p0 = scmp.lt.s32.totalorder %s2671_s8, %s2075_s18 }
  0x3e   : > { %p2072_p10 = pnand %p2070_p8, %p2678_p9  ;;  %p2078_p6 = scmp.lt.s32.totalorder %s2076_s7, %s2069_s12 }
  0x40   : > { %p2073_p1 = pneg %p2072_p10  ;;  %p2079_p12 = por %p2078_p6, %p2077_p0 }
  0x42   : > { %p2080_p13 = pnand %p2079_p12, %p2073_p1 }
  0x44   : > { %2083 = shalt.err (!%p2080_p13)
}
  0x45   : > { %s3334_s5 = smov 128   ;;  %s3336_s23 = smov 64  }
  0x46   : > { %s3339_s30 = smov 4   ;;  %s3387_s12 = scalar_lea.sflag [#allocation7], %s2650_s11 }
  0x47   : > { %1848 = dma.hbm_to_vmem [thread:$0]  (!%p2667_p7), %s2662_s10, 2048, %s2671_s8, %s3387_s12, %s3334_s5, %s3336_s23, %s3339_s30  }
  0x48   : > { %p1642_p0 = scmp.ge.s32.totalorder %s2486_s27, 1  ;;  %p507_p1 = scmp.lt.s32.totalorder %s2486_s27, 5 }
  0x49   : > { %s3390_s3 = sld [smem:[#allocation44_spill]]  ;;  %s428_s4 = scalar_lea.vmem [#allocation9], %s2653_s13 }
  0x4a   : > { %p2708_p4 = pnand %p1642_p0, %p507_p1  ;;  %s434_s15 = sshll.u32 %s428_s4, 4  ;;  %s2719_s15 = int_to_ptr.vmem [resolvable:$true] %s434_s15 }
  0x4b   : > { %s3338_s8 = scalar_lea.sflag [#allocation10], %s2650_s11 }
  0x4c   : > { %s3388_s9 = scalar_select %p2708_p4, 1, 0 }
  0x4e   : > { %3389 = sst [smem:[#allocation35_spill]] %s3388_s9 }
  0x4f   : > { %s2716_s1 = scalar_lea.hbm %s3390_s3, %s2656_s14  ;;  %s2089_s18 = scalar_lea.hbm %s3390_s3, 4096 }
  0x50   : > { %s2084_s10 = scalar_lea.hbm %s2716_s1, 2048  ;;  %p2090_p3 = scmp.lt.u32.totalorder %s2716_s1, %s3390_s3 }
  0x51   : > { %p2085_p6 = scmp.ne.s32.totalorder %s2716_s1, %s2084_s10  ;;  %p2091_p5 = scmp.lt.u32.totalorder %s2089_s18, %s2084_s10 }
  0x52   : > { %p2093_p10 = scmp.lt.u32.totalorder %s2084_s10, %s2716_s1 }
  0x53   : > { %p2087_p11 = pnand %p2085_p6, %p2678_p9  ;;  %p2092_p8 = por %p2091_p5, %p2090_p3 }
  0x55   : > { %p2088_p2 = pneg %p2087_p11  ;;  %p2094_p12 = por %p2093_p10, %p2092_p8 }
  0x57   : > { %p2095_p13 = pnand %p2094_p12, %p2088_p2 }
  0x59   : > { %2098 = shalt.err (!%p2095_p13)
}
  0x5a   : > { %s2099_s4 = scalar_lea.vmem %s2719_s15, 2048  ;;  %s2492_s5 = smov [#allocation9]  }
  0x5b   : > { %p2100_p0 = scmp.ne.s32.totalorder %s2719_s15, %s2099_s4  ;;  %s2104_s12 = sshll.u32 %s2492_s5, 4  ;;  %s2105_s12 = int_to_ptr.vmem [resolvable:$false] %s2104_s12 }
  0x5c   : > { %s2106_s23 = scalar_lea.vmem %s2105_s12, 4096  ;;  %p2107_p11 = scmp.lt.s32.totalorder %s2719_s15, %s2105_s12 }
  0x5d   : > { %p2102_p1 = pnand %p2100_p0, %p2678_p9  ;;  %p2108_p4 = scmp.lt.s32.totalorder %s2106_s23, %s2099_s4 }
  0x5f   : > { %p2103_p6 = pneg %p2102_p1  ;;  %p2109_p3 = por %p2108_p4, %p2107_p11 }
  0x61   : > { %p2110_p5 = pnand %p2109_p3, %p2103_p6 }
  0x63   : > { %2113 = shalt.err (!%p2110_p5)
}
  0x64   : > { %s3391_s10 = smov 64   ;;  %s3392_s18 = smov 128  }
  0x65   : > { %1854 = dma.hbm_to_vmem [thread:$0]  (!%p2667_p7), %s2716_s1, 2048, %s2719_s15, %s3338_s8, %s3392_s18, %s3391_s10, %s3339_s30  }
  0x66   : > { %s49_s7 = sadd.s32 1, %s2478_s25  ;;  %s52_s4 = sadd.s32 1, %s2482_s26 }
  0x67   : > { %p50_p4 = scmp.ge.s32.totalorder %s49_s7, 2  ;;  %s59_s5 = sadd.s32 1, %s2466_s22 }
  0x68   : > { %p66_p2 = scmp.ne.s32.totalorder %s2466_s22, %s2462_s21  ;;  %p72_p8 = scmp.ne.s32.totalorder %s2462_s21, %s2458_s20 }
  0x69   : > { %s3476_s7 = smov (%p50_p4, %s49_s7), 0  ;;  %s3478_s4 = smov (!%p50_p4, %s52_s4), %s2482_s26 }
  0x6a   : > { %3393 = sst [smem:[#allocation36_spill]] %s3476_s7  ;;  %s56_s12 = ssub.s32 %s2478_s25, %s3476_s7 }
  0x6b   : > { %p3394_p10 = scmp.eq.s32.totalorder %s2486_s27, 0  ;;  %p54_p13 = scmp.ge.s32.totalorder %s3478_s4, 2 }
  0x6c   : > { %p57_p0 = scmp.eq.s32.totalorder %s56_s12, 0  ;;  %p3396_p1 = scmp.eq.s32.totalorder %s2632_s28, 0 }
  0x6d   : > { %p2762_p12 = por %p3394_p10, %p66_p2  ;;  %s3346_s20 = sand.u32 1, %s2466_s22  }
  0x6e   : > { %p2768_p6 = por %p3396_p1, %p72_p8  ;;  %s3480_s4 = smov (%p54_p13, %s3478_s4), 0 }
  0x6f   : > { %3399 = sst [smem:[#allocation38_spill]] %s3480_s4  ;;  %s82_s8 = ssub.s32 %s2482_s26, %s3480_s4 }
  0x70   : > { %s3397_s15 = scalar_select %p2768_p6, 1, 0 }
  0x71   : > { %s2776_s23 = scalar_select %p57_p0, %s2466_s22, %s59_s5  }
  0x72   : > { %3398 = sst [smem:[#allocation37_spill]] %s3397_s15  ;;  %s2782_s30 = sshll.u32 %s3346_s20, 4 }
  0x73   : > { %3400 = sst [smem:[#allocation39_spill]] %s2776_s23  ;;  %p83_p11 = scmp.eq.s32.totalorder %s82_s8, 0 }
  0x74   : > { %s162_s3 = sor.u32 %s82_s8, %s56_s12  ;;  %s2789_s21 = sshll.u32 %s2478_s25, 8 }
  0x75   : > { %p2784_p3 = scmp.eq.s32.totalorder %s162_s3, 0  ;;  %s3402_s15 = sadd.s32 1, %s2454_s19 }
  0x76   : > { %s2794_s9 = scalar_select %p83_p11, %s2454_s19, %s3402_s15  }
  0x77   : > { %s3401_s7 = scalar_select %p2784_p3, 1, 0 }
  0x78   : > { %3403 = sst [smem:[#allocation40_spill]] %s2794_s9  ;;  %p3404_p5 = scmp.lt.s32.totalorder %s2486_s27, 4 }
  0x79   : > { %s3406_s6 = sld [smem:[#allocation46_spill]]  ;;  %s471_s8 = scalar_lea.vmem [#allocation12], %s2782_s30 }
  0x7a   : > { %p2800_p4 = pnand %p3404_p5, %p2762_p12  ;;  %s478_s12 = sshll.u32 %s471_s8, 4  ;;  %s2811_s12 = int_to_ptr.vmem [resolvable:$true] %s478_s12 }
  0x7c   : > { %s3405_s5 = scalar_select %p2800_p4, 1, 0 }
  0x7d   : > { %p2818_p8 = pneg %p2800_p4 }
  0x7f   : > { %s2808_s3 = scalar_lea.hbm %s3406_s6, %s2789_s21  ;;  %s2119_s9 = scalar_lea.hbm %s3406_s6, 512 }
  0x80   : > { %s2114_s15 = scalar_lea.hbm %s2808_s3, 256  ;;  %p2120_p13 = scmp.lt.u32.totalorder %s2808_s3, %s3406_s6 }
  0x81   : > { %p2115_p2 = scmp.ne.s32.totalorder %s2808_s3, %s2114_s15  ;;  %p2121_p0 = scmp.lt.u32.totalorder %s2119_s9, %s2114_s15 }
  0x82   : > { %p2123_p11 = scmp.lt.u32.totalorder %s2114_s15, %s2808_s3 }
  0x83   : > { %p2117_p10 = pnand %p2818_p8, %p2115_p2  ;;  %p2122_p1 = por %p2121_p0, %p2120_p13 }
  0x85   : > { %p2118_p12 = pneg %p2117_p10  ;;  %p2124_p5 = por %p2123_p11, %p2122_p1 }
  0x87   : > { %p2125_p6 = pnand %p2124_p5, %p2118_p12 }
  0x89   : > { %2128 = shalt.err (!%p2125_p6)
}
  0x8a   : > { %s2129_s1 = scalar_lea.vmem %s2811_s12, 256  ;;  %s2493_s4 = smov [#allocation12]  }
  0x8b   : > { %p2130_p2 = scmp.ne.s32.totalorder %s2811_s12, %s2129_s1  ;;  %s2134_s20 = sshll.u32 %s2493_s4, 4  ;;  %s2135_s20 = int_to_ptr.vmem [resolvable:$false] %s2134_s20 }
  0x8c   : > { %s2136_s19 = scalar_lea.vmem %s2135_s20, 512  ;;  %p2137_p7 = scmp.lt.s32.totalorder %s2811_s12, %s2135_s20 }
  0x8d   : > { %p2132_p10 = pnand %p2130_p2, %p2818_p8  ;;  %p2138_p9 = scmp.lt.s32.totalorder %s2136_s19, %s2129_s1 }
  0x8f   : > { %p2133_p3 = pneg %p2132_p10  ;;  %p2139_p13 = por %p2138_p9, %p2137_p7 }
  0x91   : > { %p2140_p0 = pnand %p2139_p13, %p2133_p3 }
  0x93   : > { %2143 = shalt.err (!%p2140_p0)
}
  0x94   : > { %s3357_s9 = smov 8   ;;  %s3408_s15 = scalar_lea.sflag [#allocation13], %s2650_s11 }
  0x95   : > { %1860 = dma.hbm_to_vmem [thread:$0]  (!%p2800_p4), %s2808_s3, 256, %s2811_s12, %s3408_s15, %s3392_s18, %s3392_s18, %s3357_s9  }
  0x96   : > { %s3409_s0 = sld [smem:[#allocation41_spill]]  ;;  %s366_s20 = scalar_lea.vmem [#allocation3], %s2782_s30 }
  0x97   : > { %s374_s19 = sshll.u32 %s366_s20, 4  ;;  %s3410_s6 = sand.u32 1, %s2466_s22   ;;  %s2853_s19 = int_to_ptr.vmem [resolvable:$true] %s374_s19 }
  0x98   : > { %s2857_s26 = scalar_lea.sflag [#allocation4], %s3410_s6 }
  0x9c   : > { %s2850_s4 = scalar_lea.hbm %s3409_s0, %s2789_s21  ;;  %s2149_s15 = scalar_lea.hbm %s3409_s0, 512 }
  0x9d   : > { %s2144_s25 = scalar_lea.hbm %s2850_s4, 256  ;;  %p2150_p3 = scmp.lt.u32.totalorder %s2850_s4, %s3409_s0 }
  0x9e   : > { %p2145_p7 = scmp.ne.s32.totalorder %s2850_s4, %s2144_s25  ;;  %p2151_p12 = scmp.lt.u32.totalorder %s2149_s15, %s2144_s25 }
  0x9f   : > { %p2153_p11 = scmp.lt.u32.totalorder %s2144_s25, %s2850_s4 }
  0xa0   : > { %p2147_p9 = pnand %p2145_p7, %p2818_p8  ;;  %p2152_p1 = por %p2151_p12, %p2150_p3 }
  0xa2   : > { %p2148_p6 = pneg %p2147_p9  ;;  %p2154_p5 = por %p2153_p11, %p2152_p1 }
  0xa4   : > { %p2155_p2 = pnand %p2154_p5, %p2148_p6 }
  0xa6   : > { %2158 = shalt.err (!%p2155_p2)
}
  0xa7   : > { %s2159_s6 = scalar_lea.vmem %s2853_s19, 256  ;;  %s2495_s20 = smov [#allocation3]  }
  0xa8   : > { %p2160_p10 = scmp.ne.s32.totalorder %s2853_s19, %s2159_s6  ;;  %s2164_s3 = sshll.u32 %s2495_s20, 4  ;;  %s2165_s3 = int_to_ptr.vmem [resolvable:$false] %s2164_s3 }
  0xa9   : > { %s2166_s12 = scalar_lea.vmem %s2165_s3, 512  ;;  %p2167_p7 = scmp.lt.s32.totalorder %s2853_s19, %s2165_s3 }
  0xaa   : > { %p2162_p13 = pnand %p2160_p10, %p2818_p8  ;;  %p2168_p9 = scmp.lt.s32.totalorder %s2166_s12, %s2159_s6 }
  0xac   : > { %p2163_p0 = pneg %p2162_p13  ;;  %p2169_p3 = por %p2168_p9, %p2167_p7 }
  0xae   : > { %p2170_p12 = pnand %p2169_p3, %p2163_p0 }
  0xb0   : > { %2173 = shalt.err (!%p2170_p12)
}
  0xb1   : > { %1845 = dma.hbm_to_vmem [thread:$0]  (!%p2800_p4), %s2850_s4, 256, %s2853_s19, %s2857_s26, %s3392_s18, %s3392_s18, %s3357_s9  }
  0xb2   : > { %s3411_s2 = sld [smem:[#allocation43_spill]]  ;;  %s408_s1 = scalar_lea.vmem [#allocation8], %s2653_s13 }
  0xb3   : > { %s414_s6 = sshll.u32 %s408_s1, 4  ;;  %p3412_p1 = scmp.ne.s32.totalorder %s3386_s29, 0  ;;  %s2891_s6 = int_to_ptr.vmem [resolvable:$true] %s414_s6 }
  0xb8   : > { %s2888_s8 = scalar_lea.hbm %s3411_s2, %s2656_s14  ;;  %s2179_s4 = scalar_lea.hbm %s3411_s2, 4096 }
  0xb9   : > { %s2174_s20 = scalar_lea.hbm %s2888_s8, 2048  ;;  %p2180_p2 = scmp.lt.u32.totalorder %s2888_s8, %s3411_s2 }
  0xba   : > { %p2175_p6 = scmp.ne.s32.totalorder %s2888_s8, %s2174_s20  ;;  %p2181_p10 = scmp.lt.u32.totalorder %s2179_s4, %s2174_s20 }
  0xbb   : > { %p2183_p0 = scmp.lt.u32.totalorder %s2174_s20, %s2888_s8 }
  0xbc   : > { %p2177_p11 = pnand %p2175_p6, %p3412_p1  ;;  %p2182_p13 = por %p2181_p10, %p2180_p2 }
  0xbe   : > { %p2178_p5 = pneg %p2177_p11  ;;  %p2184_p7 = por %p2183_p0, %p2182_p13 }
  0xc0   : > { %p2185_p9 = pnand %p2184_p7, %p2178_p5 }
  0xc2   : > { %2188 = shalt.err (!%p2185_p9)
}
  0xc3   : > { %s2189_s13 = scalar_lea.vmem %s2891_s6, 2048  ;;  %s2496_s12 = smov [#allocation8]  }
  0xc4   : > { %p2190_p3 = scmp.ne.s32.totalorder %s2891_s6, %s2189_s13  ;;  %s2194_s25 = sshll.u32 %s2496_s12, 4  ;;  %s2195_s25 = int_to_ptr.vmem [resolvable:$false] %s2194_s25 }
  0xc5   : > { %s2196_s15 = scalar_lea.vmem %s2195_s25, 4096  ;;  %p2197_p11 = scmp.lt.s32.totalorder %s2891_s6, %s2195_s25 }
  0xc6   : > { %p2192_p12 = pnand %p2190_p3, %p3412_p1  ;;  %p2198_p4 = scmp.lt.s32.totalorder %s2196_s15, %s2189_s13 }
  0xc8   : > { %p2193_p6 = pneg %p2192_p12  ;;  %p2199_p2 = por %p2198_p4, %p2197_p11 }
  0xca   : > { %p2200_p10 = pnand %p2199_p2, %p2193_p6 }
  0xcc   : > { %2203 = shalt.err (!%p2200_p10)
}
  0xcd   : > { %p3413_p5 = scmp.ne.s32.totalorder %s3385_s24, 0  ;;  %s3414_s1 = smov 4  }
  0xce   : > { %s3415_s20 = scalar_lea.sflag [#allocation7], %s2650_s11  ;;  %s3416_s29 = sld [smem:[#allocation26_spill]] }
  0xcf   : > { %s3417_s24 = sld [smem:[#allocation32_spill]]  ;;  %s3418_s3 = sld [smem:[#allocation33_spill]] }
  0xd0   : > { %1851 = dma.hbm_to_vmem [thread:$0]  (!%p3413_p5), %s2888_s8, 2048, %s2891_s6, %s3415_s20, %s3392_s18, %s3391_s10, %s3414_s1  }
  0xd1   : > { %s3356_s26 = sadd.s32 4294967294, %s2486_s27   ;;  %s165_s4 = sadd.s32 1, %s2442_s17 }
  0xd2   : > { %p172_p4 = scmp.ne.s32.totalorder %s2442_s17, %s2438_s16  ;;  %p3419_p1 = scmp.ne.s32.totalorder %s3401_s7, 0 }
  0xd3   : > { %p3420_p13 = scmp.eq.s32.totalorder %s2486_s27, 0  ;;  %p277_p9 = scmp.eq.s32.totalorder %s2632_s28, 3 }
  0xd4   : > { %s2926_s19 = scalar_select %p3419_p1, %s2442_s17, %s165_s4  }
  0xd5   : > { %p2930_p0 = por %p172_p4, %p3420_p13  ;;  %p178_p7 = scmp.ne.s32.totalorder %s2438_s16, %s3416_s29 }
  0xd6   : > { %p283_p3 = scmp.eq.s32.totalorder %s3356_s26, 3  ;;  %p3422_p12 = scmp.eq.s32.totalorder %s2632_s28, 0 }
  0xd7   : > { %s446_s7 = sand.u32 1, %s2442_s17   ;;  %p2946_p11 = por %p277_p9, %p172_p4 }
  0xd8   : > { %p2941_p6 = por %p178_p7, %p3422_p12  ;;  %p2950_p2 = por %p283_p3, %p178_p7 }
  0xd9   : > { %s3424_s6 = scalar_select %p2946_p11, 1, 0 }
  0xda   : > { %s3423_s8 = scalar_select %p2941_p6, 1, 0 }
  0xdb   : > { %s3425_s13 = scalar_select %p2950_p2, 1, 0 }
  0xdc   : > { %s1632_s12 = sshll.u32 %s446_s7, 3  ;;  %s1725_s25 = sshll.u32 %s3417_s24, 2 }
  0xdd   : > { %s454_s15 = sadd.s32 %s3418_s3, %s1725_s25  ;;  %s448_s29 = scalar_lea.vmem [#allocation11], %s1632_s12 }
  0xde   : > { %s1635_s20 = sshll.u32 %s454_s15, 6  ;;  %s457_s4 = sshll.u32 %s448_s29, 4  ;;  %s2961_s4 = int_to_ptr.vmem [resolvable:$true] %s457_s4 }
  0xdf   : > { %s3426_s0 = sld [smem:[#allocation45_spill]]  ;;  %p3427_p10 = scmp.lt.s32.totalorder %s2486_s27, 4 }
  0xe0   : > { %s3429_s12 = sld [smem:[#allocation47_spill]]  ;;  %s492_s26 = scalar_lea.vmem [#allocation14], %s2782_s30 }
  0xe1   : > { %p2967_p5 = pnand %p3427_p10, %p2930_p0  ;;  %s499_s25 = sshll.u32 %s492_s26, 4  ;;  %s2978_s25 = int_to_ptr.vmem [resolvable:$true] %s499_s25 }
  0xe3   : > { %p2206_p1 = pneg %p2967_p5 }
  0xe5   : > { %s2959_s2 = scalar_lea.hbm %s3426_s0, %s1635_s20  ;;  %s2209_s29 = scalar_lea.hbm %s3426_s0, 512 }
  0xe6   : > { %s2975_s9 = scalar_lea.hbm %s3429_s12, %s2789_s21  ;;  %s2204_s15 = scalar_lea.hbm %s2959_s2, 128 }
  0xe7   : > { %p2205_p4 = scmp.ne.s32.totalorder %s2959_s2, %s2204_s15  ;;  %p2210_p7 = scmp.lt.u32.totalorder %s2959_s2, %s3426_s0 }
  0xe8   : > { %p2211_p9 = scmp.lt.u32.totalorder %s2209_s29, %s2204_s15  ;;  %p2213_p12 = scmp.lt.u32.totalorder %s2204_s15, %s2959_s2 }
  0xe9   : > { %p2207_p13 = pnand %p2206_p1, %p2205_p4 }
  0xea   : > { %p2212_p3 = por %p2211_p9, %p2210_p7 }
  0xeb   : > { %p2208_p0 = pneg %p2207_p13 }
  0xec   : > { %p2214_p10 = por %p2213_p12, %p2212_p3 }
  0xee   : > { %p2215_p2 = pnand %p2214_p10, %p2208_p0 }
  0xf0   : > { %2218 = shalt.err (!%p2215_p2)
}
  0xf1   : > { %s2219_s21 = scalar_lea.vmem %s2961_s4, 128  ;;  %s2497_s30 = smov [#allocation11]  }
  0xf2   : > { %p2220_p4 = scmp.ne.s32.totalorder %s2961_s4, %s2219_s21  ;;  %s2224_s26 = sshll.u32 %s2497_s30, 4  ;;  %s2225_s26 = int_to_ptr.vmem [resolvable:$false] %s2224_s26 }
  0xf3   : > { %s2226_s14 = scalar_lea.vmem %s2225_s26, 256  ;;  %p2227_p6 = scmp.lt.s32.totalorder %s2961_s4, %s2225_s26 }
  0xf4   : > { %p2222_p13 = pnand %p2220_p4, %p2206_p1  ;;  %p2228_p7 = scmp.lt.s32.totalorder %s2226_s14, %s2219_s21 }
  0xf6   : > { %p2223_p11 = pneg %p2222_p13  ;;  %p2229_p9 = por %p2228_p7, %p2227_p6 }
  0xf8   : > { %p2230_p3 = pnand %p2229_p9, %p2223_p11 }
  0xfa   : > { %2233 = shalt.err (!%p2230_p3)
}
  0xfb   : > { %s3430_s15 = scalar_lea.sflag [#allocation10], %s2650_s11  ;;  %s2234_s20 = scalar_lea.hbm %s2975_s9, 256 }
  0xfc   : > { %1857 = dma.hbm_to_vmem [thread:$0]  (!%p2967_p5), %s2959_s2, 128, %s2961_s4, %s3430_s15, %s3392_s18, %s3391_s10, %s3414_s1  }
  0xfd   : > { %p2235_p2 = scmp.ne.s32.totalorder %s2975_s9, %s2234_s20  ;;  %s2239_s24 = scalar_lea.hbm %s3429_s12, 512 }
  0xfe   : > { %p2240_p1 = scmp.lt.u32.totalorder %s2975_s9, %s3429_s12  ;;  %p2241_p0 = scmp.lt.u32.totalorder %s2239_s24, %s2234_s20 }
  0xff   : > { %p2237_p6 = pnand %p2235_p2, %p2818_p8  ;;  %p2243_p10 = scmp.lt.u32.totalorder %s2234_s20, %s2975_s9 }
 0x100   : > { %p2242_p12 = por %p2241_p0, %p2240_p1 }
 0x101   : > { %p2238_p11 = pneg %p2237_p6 }
 0x102   : > { %p2244_p4 = por %p2243_p10, %p2242_p12 }
 0x104   : > { %p2245_p13 = pnand %p2244_p4, %p2238_p11 }
 0x106   : > { %2248 = shalt.err (!%p2245_p13)
}
 0x107   : > { %s2249_s2 = scalar_lea.vmem %s2978_s25, 256  ;;  %s2498_s10 = smov [#allocation14]  }
 0x108   : > { %p2250_p5 = scmp.ne.s32.totalorder %s2978_s25, %s2249_s2  ;;  %s2254_s1 = sshll.u32 %s2498_s10, 4  ;;  %s2255_s1 = int_to_ptr.vmem [resolvable:$false] %s2254_s1 }
 0x109   : > { %s2256_s4 = scalar_lea.vmem %s2255_s1, 512  ;;  %p2257_p3 = scmp.lt.s32.totalorder %s2978_s25, %s2255_s1 }
 0x10a   : > { %p2252_p7 = pnand %p2250_p5, %p2818_p8  ;;  %p2258_p2 = scmp.lt.s32.totalorder %s2256_s4, %s2249_s2 }
 0x10c   : > { %p2253_p9 = pneg %p2252_p7  ;;  %p2259_p6 = por %p2258_p2, %p2257_p3 }
 0x10e   : > { %p2260_p1 = pnand %p2259_p6, %p2253_p9 }
 0x110   : > { %2263 = shalt.err (!%p2260_p1)
}
 0x111   : > { %p3431_p11 = scmp.ne.s32.totalorder %s3405_s5, 0  ;;  %s3432_s30 = smov 8  }
 0x112   : > { %s3433_s26 = scalar_lea.sflag [#allocation13], %s2650_s11  ;;  %s3434_s23 = sld [smem:[#allocation35_spill]] }
 0x113   : > { %1863 = dma.hbm_to_vmem [thread:$0]  (!%p3431_p11), %s2975_s9, 256, %s2978_s25, %s3433_s26, %s3392_s18, %s3392_s18, %s3432_s30  }
 0x118   : > { %p3435_p8 = scmp.ne.s32.totalorder %s3434_s23, 0 }
 0x119   : > { %s3436_s14 = sld [smem:[#allocation29_spill]] (!%p3435_p8)  ;;  %s3437_s15 = sld [smem:[#allocation37_spill]] (!%p3435_p8) }
 0x11a   : > { %511 = sbr.rel (%p3435_p8) target bundleno = 917 (0x395), region = 52 }
 0x11f   : > { %s513_s20 = sand.u32 (!%p3435_p8), 1, %s3436_s14   ;;  %p3438_p0 = scmp.ne.s32.totalorder (!%p3435_p8), %s3437_s15, 0 }
 0x120   : > { %s3039_s29 = sshll.u32 (!%p3435_p8), %s513_s20, 4  ;;  %s514_s7 = scalar_lea.sflag (!%p3435_p8), [#allocation4], %s513_s20 }
 0x121   : > { %s517_s24 = scalar_lea.vmem [#allocation3], %s3039_s29 }
 0x122   : > { %2405 = dma.done.wait (%p3438_p0), %s514_s7, 256  }
 0x123   : > { %2407 = vsyncadd (%p3438_p0), %s514_s7, 4294967040  ;;  %s3439_s11 = sld [smem:[#allocation27_spill]]  ;;  %s3440_s5 = sld [smem:[#allocation34_spill]] }
 0x124   : > { %s3047_s18 = sand.u32 1, %s2632_s28  }
 0x125   : > { %s523_s3 = scalar_lea.sflag [#allocation7], %s3047_s18 }
 0x129   : > { %s524_s9 = sand.u32 1, %s3439_s11   ;;  %p3441_p12 = scmp.ne.s32.totalorder %s3440_s5, 0 }
 0x12a   : > { %s1644_s25 = sshll.u32 %s524_s9, 7 }
 0x12b   : > { %s3051_s21 = scalar_lea.vmem [#allocation6], %s1644_s25 }
 0x12c   : > { %2409 = dma.done.wait (%p3441_p12), %s523_s3, 4096  }
 0x12d   : > { %2411 = vsyncadd (%p3441_p12), %s523_s3, 4294963200  ;;  %s3057_s2 = scalar_lea.vmem [#allocation8], %s1644_s25  ;;  %s541_s10 = scalar_lea.sflag [#allocation10], %s3047_s18 }
 0x12e   : > { %s3060_s1 = scalar_lea.vmem [#allocation9], %s1644_s25 }
 0x12f   : > { %2413 = dma.done.wait (%p3441_p12), %s541_s10, 2048  }
 0x130   : > { %2415 = vsyncadd (%p3441_p12), %s541_s10, 4294965248  ;;  %s551_s28 = sand.u32 1, %s2438_s16   ;;  %p3442_p10 = scmp.ne.s32.totalorder %s3423_s8, 0 }
 0x131   : > { %s3069_s4 = sshll.u32 %s551_s28, 3 }
 0x132   : > { %s553_s30 = scalar_lea.vmem [#allocation11], %s3069_s4 }
 0x133   : > { %2417 = dma.done.wait (%p3442_p10), %s541_s10, 128  }
 0x134   : > { %2419 = vsyncadd (%p3442_p10), %s541_s10, 4294967168  ;;  %s559_s26 = scalar_lea.sflag [#allocation13], %s3047_s18  ;;  %s562_s23 = scalar_lea.vmem [#allocation12], %s3039_s29 }
 0x135   : > { %2421 = dma.done.wait (%p3438_p0), %s559_s26, 512  }
 0x136   : > { %2423 = vsyncadd (%p3438_p0), %s559_s26, 4294966784  ;;  %v1995_v0 = vld [vmem:[%s3051_s21 + $0x40] sm:$0xff]   ;;  %v1999_v4 = vld [vmem:[%s3051_s21 + $0x48] sm:$0xff]   ;;  %s1175_s8 = sld [smem:[#allocation2]]  ;;  %s3361_s15 = smov 64  }
 0x137   : > { %v1996_v1 = vld [vmem:[%s3057_s2 + $0x40] sm:$0xff]   ;;  %1756 = vmatprep.subr.bf16.mxu0 %v1995_v0  ;;  %v2000_v5 = vld [vmem:[%s3057_s2 + $0x48] sm:$0xff]   ;;  %v2003_v8 = vld [vmem:[%s3051_s21 + $0x50] sm:$0xff]   ;;  %s647_s20 = scalar_lea.vmem [#allocation18], %s3069_s4  ;;  %s3443_s7 = sld [smem:[#allocation30_spill]] }
 0x138   : > { %v1997_v2 = vld [vmem:[%s3051_s21] sm:$0xff]   ;;  %1778 = vmatprep.subr.bf16.mxu1 %v1996_v1  ;;  %v2001_v6 = vld [vmem:[%s3051_s21 + $0x8] sm:$0xff]   ;;  %v2004_v9 = vld [vmem:[%s3057_s2 + $0x50] sm:$0xff]   ;;  %s571_s11 = scalar_lea.vmem [#allocation14], %s3039_s29  ;;  %s1336_s9 = sshll.u32 %s647_s20, 4  ;;  %s3149_s9 = int_to_ptr.vmem [resolvable:$true] %s1336_s9 }
 0x139   : > { %v1998_v3 = vld [vmem:[%s3057_s2] sm:$0xff]   ;;  %1757 = vmatpush3.bf16.msra.mxu0 %v1997_v2  ;;  %v2002_v7 = vld [vmem:[%s3057_s2 + $0x8] sm:$0xff]   ;;  %v2005_v10 = vld [vmem:[%s3051_s21 + $0x10] sm:$0xff]   ;;  %s633_s3 = scalar_lea.vmem [#allocation15], %s3069_s4  ;;  %s3445_s26 = sld [smem:[#allocation48_spill]] }
 0x13a   : > { %1779 = vmatpush3.bf16.msra.mxu1 %v1998_v3  ;;  %1758 = vmatprep.subr.bf16.mxu0 %v1999_v4  ;;  %v2006_v11 = vld [vmem:[%s3057_s2 + $0x10] sm:$0xff]   ;;  %v2007_v12 = vld [vmem:[%s3051_s21 + $0x58] sm:$0xff]   ;;  %v2011_v16 = vld [vmem:[%s3051_s21 + $0x60] sm:$0xff]   ;;  %s3175_s0 = scalar_lea.sflag [#allocation5], %s551_s28  ;;  %p3450_p13 = scmp.ne.s32.totalorder %s3424_s6, 0 }
 0x13b   : > { %1780 = vmatprep.subr.bf16.mxu1 %v2000_v5  ;;  %v2008_v13 = vld [vmem:[%s3057_s2 + $0x58] sm:$0xff]   ;;  %v2012_v17 = vld [vmem:[%s3057_s2 + $0x60] sm:$0xff]   ;;  %v2015_v20 = vld [vmem:[%s3051_s21 + $0x68] sm:$0xff]  }
 0x13c   : > { %v2009_v14 = vld [vmem:[%s3051_s21 + $0x18] sm:$0xff]   ;;  %v2013_v18 = vld [vmem:[%s3051_s21 + $0x20] sm:$0xff]   ;;  %v2016_v21 = vld [vmem:[%s3057_s2 + $0x68] sm:$0xff]   ;;  %s1176_s14 = ssub.f32 1.0, %s1175_s8 }
 0x13d   : > { %1759 = vmatpush3.bf16.msra.mxu0 %v2001_v6  ;;  %v2010_v15 = vld [vmem:[%s3057_s2 + $0x18] sm:$0xff]   ;;  %v2014_v19 = vld [vmem:[%s3057_s2 + $0x20] sm:$0xff]   ;;  %v2017_v22 = vld [vmem:[%s3051_s21 + $0x28] sm:$0xff]   ;;  %s1734_s5 = sshll.u32 %s3443_s7, 2  ;;  %s3447_s7 = sld [smem:[#allocation49_spill]] }
 0x13e   : > { %1781 = vmatpush3.bf16.msra.mxu1 %v2002_v7  ;;  %1760 = vmatprep.subr.bf16.mxu0 %v2003_v8  ;;  %v2018_v23 = vld [vmem:[%s3057_s2 + $0x28] sm:$0xff]   ;;  %v2019_v24 = vld [vmem:[%s3051_s21 + $0x70] sm:$0xff]   ;;  %v2023_v28 = vld [vmem:[%s3051_s21 + $0x78] sm:$0xff]  }
 0x13f   : > { %1782 = vmatprep.subr.bf16.mxu1 %v2004_v9  ;;  %v2020_v25 = vld [vmem:[%s3057_s2 + $0x70] sm:$0xff]   ;;  %v2024_v29 = vld [vmem:[%s3057_s2 + $0x78] sm:$0xff]   ;;  %v2030_v34 = vld [vmem:[%s3060_s1 + $0x40] sm:$0xff]  }
 0x140   : > { %v2021_v26 = vld [vmem:[%s3051_s21 + $0x30] sm:$0xff]   ;;  %v2025_v30 = vld [vmem:[%s3051_s21 + $0x38] sm:$0xff]   ;;  %v2031_v35 = vld [vmem:[%s3060_s1] sm:$0xff]   ;;  %s1300_s21 = sshll.u32 %s633_s3, 4  ;;  %s3151_s21 = int_to_ptr.vmem [resolvable:$true] %s1300_s21 }
 0x141   : > { %1761 = vmatpush3.bf16.msra.mxu0 %v2005_v10  ;;  %v2022_v27 = vld [vmem:[%s3057_s2 + $0x30] sm:$0xff]   ;;  %v2026_v31 = vld [vmem:[%s3057_s2 + $0x38] sm:$0xff]   ;;  %v2032_v36 = vld [vmem:[%s3060_s1 + $0x48] sm:$0xff]   ;;  %s3360_s2 = scalar_lea.vmem [#allocation16], %s3069_s4 }
 0x142   : > { %1783 = vmatpush3.bf16.msra.mxu1 %v2006_v11  ;;  %1762 = vmatprep.subr.bf16.mxu0 %v2007_v12  ;;  %v2027_v32 = vld [vmem:[%s517_s24 + $0x4] ss:$8 sps:$4 sm:$0xff]   ;;  %v2029_v33 = vld [vmem:[%s517_s24] ss:$8 sps:$4 sm:$0xff]   ;;  %s3444_s24 = sld [smem:[#allocation31_spill]]  ;;  %s1318_s10 = sshll.u32 %s3360_s2, 4  ;;  %s3161_s10 = int_to_ptr.vmem [resolvable:$true] %s1318_s10 }
 0x143   : > { %1784 = vmatprep.subr.bf16.mxu1 %v2008_v13  ;;  %828 = vmatprep.mubr.bf16.mxu0 %v2027_v32  ;;  %v2033_v37 = vld [vmem:[%s3060_s1 + $0x8] sm:$0xff]   ;;  %v2034_v38 = vld [vmem:[%s3060_s1 + $0x50] sm:$0xff]   ;;  %v2036_v40 = vld [vmem:[%s3060_s1 + $0x58] sm:$0xff]  }
 0x144   : > { %997 = vmatprep.mubr.bf16.mxu1 %v2027_v32  ;;  %v2035_v39 = vld [vmem:[%s3060_s1 + $0x10] sm:$0xff]   ;;  %v2037_v41 = vld [vmem:[%s3060_s1 + $0x18] sm:$0xff]   ;;  %v2038_v42 = vld [vmem:[%s3060_s1 + $0x60] sm:$0xff]  }
 0x145   : > { %1763 = vmatpush3.bf16.msra.mxu0 %v2009_v14  ;;  %v2039_v43 = vld [vmem:[%s3060_s1 + $0x20] sm:$0xff]   ;;  %v2040_v44 = vld [vmem:[%s3060_s1 + $0x68] sm:$0xff]   ;;  %v2042_v46 = vld [vmem:[%s3060_s1 + $0x70] sm:$0xff]  }
 0x146   : > { %1785 = vmatpush3.bf16.msra.mxu1 %v2010_v15  ;;  %1764 = vmatprep.subr.bf16.mxu0 %v2011_v16  ;;  %v2041_v45 = vld [vmem:[%s3060_s1 + $0x28] sm:$0xff]   ;;  %v2043_v47 = vld [vmem:[%s3060_s1 + $0x30] sm:$0xff]   ;;  %v2044_v48 = vld [vmem:[%s3060_s1 + $0x78] sm:$0xff]  }
 0x147   : > { %1786 = vmatprep.subr.bf16.mxu1 %v2012_v17  ;;  %v2045_v49 = vld [vmem:[%s3060_s1 + $0x38] sm:$0xff]   ;;  %s2264_s1 = scalar_lea.vmem %s3151_s21, 128 }
 0x148   : > { %s1297_s25 = sadd.s32 %s3444_s24, %s1734_s5  ;;  %p2265_p4 = scmp.ne.s32.totalorder %s3151_s21, %s2264_s1 }
 0x149   : > { %1765 = vmatpush3.bf16.msra.mxu0 %v2013_v18  ;;  %v1738_v18 = vld [vmem:[%s553_s30] sm:$0xff]   ;;  %s1714_s29 = sshll.u32 %s1297_s25, 6  ;;  %s3448_s25 = sld [smem:[#allocation50_spill]] }
 0x14a   : > { %1787 = vmatpush3.bf16.msra.mxu1 %v2014_v19  ;;  %1766 = vmatprep.subr.bf16.mxu0 %v2015_v20  ;;  %v1184_v19 = vstv %s1175_s8  ;;  %s3446_s8 = smov %s3445_s26  ;;  %s3166_s24 = scalar_lea.hbm %s3447_s7, %s1714_s29 }
 0x14b   : > { %1788 = vmatprep.subr.bf16.mxu1 %v2016_v21  ;;  %v1739_v21 = vunpack.c.l.bf16 %v1738_v18  ;;  %p2266_p5 = pnand %p2265_p4, %p3450_p13 }
 0x14d   : > { %1767 = vmatpush3.bf16.msra.mxu0 %v2017_v22  ;;  %p2267_p7 = pneg %p2266_p5 }
 0x14e   : > { %1789 = vmatpush3.bf16.msra.mxu1 %v2018_v23  ;;  %1768 = vmatprep.subr.bf16.mxu0 %v2019_v24  ;;  %v1740_v23 = vunpack.c.h.bf16 %v1738_v18  ;;  %v1177_v24 = vstv %s1176_s14 }
 0x14f   : > { %1790 = vmatprep.subr.bf16.mxu1 %v2020_v25  ;;  %s3449_s2 = smov %s3448_s25 }
 0x151   : > { %1769 = vmatpush3.bf16.msra.mxu0 %v2021_v26  ;;  %v1185_v26 = vmul.f32 %v1739_v21, %v1184_v19 }
 0x152   : > { %1791 = vmatpush3.bf16.msra.mxu1 %v2022_v27  ;;  %1770 = vmatprep.subr.bf16.mxu0 %v2023_v28  ;;  %v1186_v28 = vmul.f32 %v1740_v23, %v1184_v19 }
 0x153   : > { %1792 = vmatprep.subr.bf16.mxu1 %v2024_v29 }
 0x155   : > { %1771 = vmatpush3.bf16.msra.mxu0 %v2025_v30 }
 0x156   : > { %1793 = vmatpush3.bf16.msra.mxu1 %v2026_v31  ;;  %1800 = vmatprep.subr.bf16.mxu0 %v2030_v34 }
 0x158   : > { %829 = vmatmul.mubr.bf16.vlgmr.msra.gmra.mrb[0].mxu0 %v2029_v33 }
 0x159   : > { %998 = vmatmul.mubr.bf16.vlgmr.msra.gmra.mrb[0].mxu1 %v2029_v33  ;;  %1166 = vmatprep.mubr.bf16.mxu0 %v2027_v32 }
 0x15a   : > { %1801 = vmatpush3.bf16.msra.mxu0 %v2031_v35 }
 0x15b   : > { %1802 = vmatprep.subr.bf16.mxu0 %v2032_v36 }
 0x15e   : > { %1803 = vmatpush3.bf16.msra.mxu0 %v2033_v37 }
 0x15f   : > { %1804 = vmatprep.subr.bf16.mxu0 %v2034_v38 }
 0x162   : > { %1805 = vmatpush3.bf16.msra.mxu0 %v2035_v39 }
 0x163   : > { %1806 = vmatprep.subr.bf16.mxu0 %v2036_v40  ;;  %v1201_v40 = vld [vmem:[%s571_s11] sm:$0xff] }
 0x166   : > { %1807 = vmatpush3.bf16.msra.mxu0 %v2037_v41 }
 0x167   : > { %1808 = vmatprep.subr.bf16.mxu0 %v2038_v42  ;;  %v1199_v42 = vld [vmem:[%s562_s23] sm:$0xff] }
 0x16a   : > { %1809 = vmatpush3.bf16.msra.mxu0 %v2039_v43 }
 0x16b   : > { %1810 = vmatprep.subr.bf16.mxu0 %v2040_v44 }
 0x16e   : > { %1811 = vmatpush3.bf16.msra.mxu0 %v2041_v45  ;;  %v1200_v45 = vld [vmem:[%s562_s23 + $0x8] sm:$0xff]  ;;  %s3159_s23 = scalar_lea.hbm %s3445_s26, %s1714_s29 }
 0x16f   : > { %1812 = vmatprep.subr.bf16.mxu0 %v2042_v46  ;;  %v1202_v46 = vld [vmem:[%s571_s11 + $0x8] sm:$0xff] }
 0x172   : > { %1813 = vmatpush3.bf16.msra.mxu0 %v2043_v47 }
 0x173   : > { %1814 = vmatprep.subr.bf16.mxu0 %v2044_v48 }
 0x176   : > { %1815 = vmatpush3.bf16.msra.mxu0 %v2045_v49 }
 0x179   : > { %1167 = vmatmul.mubr.bf16.vlgmr.msra.gmra.mrb[4].mxu0 %v2029_v33 }
 0x22b   : > { %v1772_v50 = vpop.f32.mrb[0].mxu0 }
 0x22c   : > { %v1794_v51 = vpop.f32.mrb[0].mxu1  ;;  %v1773_v52 = vpop.f32.mrb[1].mxu0 }
 0x22d   : > { %v1774_v53 = vadd.f32 %v1773_v52, %v1772_v50  ;;  %v1795_v54 = vpop.f32.mrb[1].mxu1  ;;  %v1775_v55 = vpop.f32.mrb[2].mxu0 }
 0x22e   : > { %v1796_v56 = vadd.f32 %v1795_v54, %v1794_v51  ;;  %v1797_v57 = vpop.f32.mrb[2].mxu1  ;;  %v1776_v58 = vpop.f32.mrb[3].mxu0 }
 0x22f   : > { %v1777_v59 = vadd.f32 %v1776_v58, %v1775_v55  ;;  %v1798_v60 = vpop.f32.mrb[3].mxu1  ;;  %v1203_v61 = vmul.f32 %v1774_v53, %v1774_v53 }
 0x230   : > { %v1799_v62 = vadd.f32 %v1798_v60, %v1797_v57  ;;  %v1218_v63 = vmul.f32 %v1796_v56, %v1796_v56 }
 0x231   : > { %1205 = vadd.xlane.f32.xlu0 %v1203_v61  ;;  %v1204_v0 = vmul.f32 %v1777_v59, %v1777_v59 }
 0x232   : > { %1220 = vadd.xlane.f32.xlu1 %v1218_v63  ;;  %v1219_v1 = vmul.f32 %v1799_v62, %v1799_v62 }
 0x235   : > { %1207 = vadd.xlane.f32.xlu0 %v1204_v0 }
 0x236   : > { %1222 = vadd.xlane.f32.xlu1 %v1219_v1 }
 0x24c   : > { %v1816_v12 = vpop.f32.mrb[4].mxu0 }
 0x24d   : > { %v1817_v14 = vpop.f32.mrb[5].mxu0 }
 0x24e   : > { %v1819_v16 = vpop.f32.mrb[6].mxu0  ;;  %v1818_v17 = vadd.f32 %v1817_v14, %v1816_v12 }
 0x24f   : > { %v1820_v20 = vpop.f32.mrb[7].mxu0 }
 0x250   : > { %v1821_v22 = vadd.f32 %v1820_v20, %v1819_v16  ;;  %v1178_v25 = vmul.f32 %v1818_v17, %v1177_v24 }
 0x252   : > { %v1179_v27 = vmul.f32 %v1821_v22, %v1177_v24  ;;  %v1187_v29 = vadd.f32 %v1185_v26, %v1178_v25 }
 0x254   : > { %v1188_v30 = vadd.f32 %v1186_v28, %v1179_v27 }
 0x256   : > { %v1744_v34 = vpack.c.bf16 %v1188_v30, %v1187_v29 }
 0x258   : > { %1745 = vst [vmem:[%s647_s20] sm:$0xff] %v1744_v34  }
 0x2be   : > { %v1206_v2 = vpop.xlane.xlu0 %1205 }
 0x2bf   : > { %v1221_v3 = vpop.xlane.xlu1 %1220  ;;  %v1210_v4 = vmul.f32 0.0078125, %v1206_v2 }
 0x2c0   : > { %v1224_v5 = vmul.f32 0.0078125, %v1221_v3 }
 0x2c1   : > { %v1212_v6 = vadd.f32 1.1920929e-07, %v1210_v4 }
 0x2c2   : > { %v1226_v7 = vadd.f32 1.1920929e-07, %v1224_v5  ;;  %v1208_v8 = vpop.xlane.xlu0 %1207 }
 0x2c3   : > { %2046 = vrsqrt.f32 %v1212_v6  ;;  %v1223_v9 = vpop.xlane.xlu1 %1222  ;;  %v1211_v10 = vmul.f32 0.0078125, %v1208_v8 }
 0x2c4   : > { %2048 = vrsqrt.f32 %v1226_v7  ;;  %v1225_v11 = vmul.f32 0.0078125, %v1223_v9 }
 0x2c5   : > { %v1213_v13 = vadd.f32 1.1920929e-07, %v1211_v10 }
 0x2c6   : > { %v1227_v15 = vadd.f32 1.1920929e-07, %v1225_v11 }
 0x2c7   : > { %2050 = vrsqrt.f32 %v1213_v13 }
 0x2c8   : > { %2052 = vrsqrt.f32 %v1227_v15 }
 0x2cd   : > { %v2047_v31 = vpop.eup %2046 }
 0x2ce   : > { %v2049_v32 = vpop.eup %2048  ;;  %v1216_v33 = vmul.f32 %v2047_v31, %v1774_v53 }
 0x2cf   : > { %v1230_v35 = vmul.f32 %v2049_v32, %v1796_v56 }
 0x2d0   : > { %1234 = vrot.lane.b32.xlu0 %v1216_v33, %s3361_s15  ;;  %v1232_v47 = vmul.f32 %v1216_v33, %v1199_v42 }
 0x2d1   : > { %v2051_v36 = vpop.eup %2050  ;;  %1244 = vrot.lane.b32.xlu1 %v1230_v35, %s3361_s15  ;;  %v1242_v54 = vmul.f32 %v1230_v35, %v1199_v42 }
 0x2d2   : > { %v1217_v37 = vmul.f32 %v2051_v36, %v1777_v59  ;;  %v2053_v38 = vpop.eup %2052 }
 0x2d3   : > { %v1231_v39 = vmul.f32 %v2053_v38, %v1799_v62 }
 0x2d4   : > { %v1233_v50 = vmul.f32 %v1217_v37, %v1200_v45 }
 0x2d5   : > { %1236 = vrot.lane.b32.xlu1 %v1217_v37, %s3361_s15  ;;  %v1243_v58 = vmul.f32 %v1231_v39, %v1200_v45 }
 0x2d9   : > { %1246 = vrot.lane.b32.xlu1 %v1231_v39, %s3361_s15  ;;  %s3171_s15 = scalar_lea.hbm %s3448_s25, %s1714_s29 }
 0x342   : > { %v1235_v41 = vpop.permute.xlu0 %1234 }
 0x343   : > { %v1245_v43 = vpop.permute.xlu1 %1244  ;;  %v1238_v44 = vmul.f32 %v1235_v41, %v1201_v40 }
 0x344   : > { %v1248_v52 = vmul.f32 %v1245_v43, %v1201_v40 }
 0x345   : > { %v1240_v49 = vadd.f32 %v1238_v44, %v1232_v47 }
 0x346   : > { %v1250_v60 = vadd.f32 %v1248_v52, %v1242_v54 }
 0x347   : > { %v1237_v48 = vpop.permute.xlu1 %1236  ;;  %v1252_v56 = vmul.f32 0.088388346, %v1240_v49 }
 0x348   : > { %v1239_v51 = vmul.f32 %v1237_v48, %v1202_v46 }
 0x34a   : > { %v1241_v53 = vadd.f32 %v1239_v51, %v1233_v50 }
 0x34b   : > { %v1247_v55 = vpop.permute.xlu1 %1246 }
 0x34c   : > { %v1253_v57 = vmul.f32 0.088388346, %v1241_v53  ;;  %v1249_v59 = vmul.f32 %v1247_v55, %v1202_v46 }
 0x34e   : > { %v1749_v61 = vpack.c.bf16 %v1253_v57, %v1252_v56  ;;  %v1251_v62 = vadd.f32 %v1249_v59, %v1243_v58 }
 0x350   : > { %1750 = vst [vmem:[%s633_s3] sm:$0xff] %v1749_v61   ;;  %v1754_v63 = vpack.c.bf16 %v1251_v62, %v1250_v60  ;;  %s2500_s3 = smov [#allocation15]  }
 0x351   : > { %s2268_s30 = sshll.u32 %s2500_s3, 4  ;;  %s2269_s30 = int_to_ptr.vmem [resolvable:$false] %s2268_s30 }
 0x352   : > { %s2270_s26 = scalar_lea.vmem %s2269_s30, 256  ;;  %p2271_p9 = scmp.lt.s32.totalorder %s3151_s21, %s2269_s30 }
 0x353   : > { %p2272_p3 = scmp.lt.s32.totalorder %s2270_s26, %s2264_s1 }
 0x355   : > { %p2273_p2 = por %p2272_p3, %p2271_p9 }
 0x357   : > { %p2274_p6 = pnand %p2273_p2, %p2267_p7 }
 0x359   : > { %2277 = shalt.err (!%p2274_p6)
}
 0x35a   : > { %s2278_s28 = scalar_lea.hbm %s3159_s23, 128  ;;  %s2282_s20 = scalar_lea.hbm %s3446_s8, 512 }
 0x35b   : > { %p2279_p1 = scmp.ne.s32.totalorder %s3159_s23, %s2278_s28  ;;  %p2283_p0 = scmp.lt.u32.totalorder %s3159_s23, %s3446_s8 }
 0x35c   : > { %p2284_p12 = scmp.lt.u32.totalorder %s2282_s20, %s2278_s28  ;;  %p2286_p4 = scmp.lt.u32.totalorder %s2278_s28, %s3159_s23 }
 0x35d   : > { %p2280_p11 = pnand %p2279_p1, %p3450_p13 }
 0x35e   : > { %p2285_p10 = por %p2284_p12, %p2283_p0 }
 0x35f   : > { %p2281_p8 = pneg %p2280_p11 }
 0x360   : > { %p2287_p5 = por %p2286_p4, %p2285_p10 }
 0x362   : > { %p2288_p7 = pnand %p2287_p5, %p2281_p8 }
 0x364   : > { %2291 = shalt.err (!%p2288_p7)
}
 0x365   : > { %s2501_s25 = smov 128   ;;  %s2502_s1 = smov 4  }
 0x366   : > { %s3451_s3 = smov 64   ;;  %s3452_s30 = scalar_lea.vmem [#allocation16], %s3069_s4 }
 0x367   : > { %1836 = dma.vmem_to_hbm [thread:$0]  (%p3450_p13), %s3151_s21, 128, %s3159_s23, %s3175_s0, %s3451_s3, %s2501_s25, %s2502_s1  }
 0x368   : > { %1755 = vst [vmem:[%s3452_s30] sm:$0xff] %v1754_v63   ;;  %s1280_s26 = scalar_lea.sflag [#allocation17], %s3047_s18  ;;  %s2292_s28 = scalar_lea.vmem %s3161_s10, 128 }
 0x369   : > { %p2293_p9 = scmp.ne.s32.totalorder %s3161_s10, %s2292_s28  ;;  %s2503_s29 = smov [#allocation16]  }
 0x36a   : > { %s2296_s14 = sshll.u32 %s2503_s29, 4  ;;  %s2297_s14 = int_to_ptr.vmem [resolvable:$false] %s2296_s14 }
 0x36b   : > { %p2294_p3 = pnand %p2293_p9, %p3450_p13  ;;  %s2298_s20 = scalar_lea.vmem %s2297_s14, 256 }
 0x36c   : > { %p2299_p6 = scmp.lt.s32.totalorder %s3161_s10, %s2297_s14  ;;  %p2300_p1 = scmp.lt.s32.totalorder %s2298_s20, %s2292_s28 }
 0x36d   : > { %p2295_p2 = pneg %p2294_p3 }
 0x36e   : > { %p2301_p11 = por %p2300_p1, %p2299_p6 }
 0x370   : > { %p2302_p8 = pnand %p2301_p11, %p2295_p2 }
 0x372   : > { %2305 = shalt.err (!%p2302_p8)
}
 0x373   : > { %s2306_s0 = scalar_lea.hbm %s3166_s24, 128  ;;  %s2310_s23 = scalar_lea.hbm %s3447_s7, 512 }
 0x374   : > { %p2307_p0 = scmp.ne.s32.totalorder %s3166_s24, %s2306_s0  ;;  %p2311_p4 = scmp.lt.u32.totalorder %s3166_s24, %s3447_s7 }
 0x375   : > { %p2312_p5 = scmp.lt.u32.totalorder %s2310_s23, %s2306_s0  ;;  %p2314_p9 = scmp.lt.u32.totalorder %s2306_s0, %s3166_s24 }
 0x376   : > { %p2308_p12 = pnand %p2307_p0, %p3450_p13 }
 0x377   : > { %p2313_p7 = por %p2312_p5, %p2311_p4 }
 0x378   : > { %p2309_p10 = pneg %p2308_p12 }
 0x379   : > { %p2315_p3 = por %p2314_p9, %p2313_p7 }
 0x37b   : > { %p2316_p2 = pnand %p2315_p3, %p2309_p10 }
 0x37d   : > { %2319 = shalt.err (!%p2316_p2)
}
 0x37e   : > { %1837 = dma.vmem_to_hbm [thread:$0]  (%p3450_p13), %s3161_s10, 128, %s3166_s24, %s1280_s26, %s3451_s3, %s2501_s25, %s2502_s1  }
 0x37f   : > { %s2320_s30 = scalar_lea.vmem %s3149_s9, 128  ;;  %s2504_s28 = smov [#allocation18]  }
 0x380   : > { %p2321_p6 = scmp.ne.s32.totalorder %s3149_s9, %s2320_s30  ;;  %s2324_s29 = sshll.u32 %s2504_s28, 4  ;;  %s2325_s29 = int_to_ptr.vmem [resolvable:$false] %s2324_s29 }
 0x381   : > { %s2326_s14 = scalar_lea.vmem %s2325_s29, 256  ;;  %p2327_p8 = scmp.lt.s32.totalorder %s3149_s9, %s2325_s29 }
 0x382   : > { %p2322_p1 = pnand %p2321_p6, %p3450_p13  ;;  %p2328_p0 = scmp.lt.s32.totalorder %s2326_s14, %s2320_s30 }
 0x384   : > { %p2323_p11 = pneg %p2322_p1  ;;  %p2329_p12 = por %p2328_p0, %p2327_p8 }
 0x386   : > { %p2330_p10 = pnand %p2329_p12, %p2323_p11 }
 0x388   : > { %2333 = shalt.err (!%p2330_p10)
}
 0x389   : > { %s2334_s10 = scalar_lea.hbm %s3171_s15, 128  ;;  %s2338_s0 = scalar_lea.hbm %s3449_s2, 512 }
 0x38a   : > { %p2335_p4 = scmp.ne.s32.totalorder %s3171_s15, %s2334_s10  ;;  %p2339_p9 = scmp.lt.u32.totalorder %s3171_s15, %s3449_s2 }
 0x38b   : > { %p2340_p3 = scmp.lt.u32.totalorder %s2338_s0, %s2334_s10  ;;  %p2342_p6 = scmp.lt.u32.totalorder %s2334_s10, %s3171_s15 }
 0x38c   : > { %p2336_p5 = pnand %p2335_p4, %p3450_p13 }
 0x38d   : > { %p2341_p2 = por %p2340_p3, %p2339_p9 }
 0x38e   : > { %p2337_p7 = pneg %p2336_p5 }
 0x38f   : > { %p2343_p1 = por %p2342_p6, %p2341_p2 }
 0x391   : > { %p2344_p11 = pnand %p2343_p1, %p2337_p7 }
 0x393   : > { %2347 = shalt.err (!%p2344_p11)
}
 0x394   : > { %1838 = dma.vmem_to_hbm [thread:$0]  (%p3450_p13), %s3149_s9, 128, %s3171_s15, %s1280_s26, %s3451_s3, %s2501_s25, %s2502_s1  }
 0x395 PF: > { %s3453_s23 = sld [smem:[#allocation26_spill]]  ;;  %p1875_p8 = scmp.ge.s32.totalorder %s2486_s27, 2 }
 0x396   : > { %p3454_p0 = scmp.ne.s32.totalorder %s3425_s13, 0 }
 0x398   : > { %p1865_p12 = pnand %p1875_p8, %p3454_p0 }
 0x39b   : > { %s1351_s11 = sand.u32 1, %s3453_s23  }
 0x39c   : > { %s1352_s5 = scalar_lea.sflag [#allocation5], %s1351_s11 }
 0x39d   : > { %2425 = dma.done.wait (!%p1865_p12), %s1352_s5, 128  }
 0x39e   : > { %2427 = vsyncadd (!%p1865_p12), %s1352_s5, 4294967168  ;;  %s3455_s6 = sadd.s32 4294967294, %s2486_s27  }
 0x39f   : > { %s1360_s30 = sand.u32 1, %s3455_s6  }
 0x3a0   : > { %s1361_s28 = scalar_lea.sflag [#allocation17], %s1360_s30 }
 0x3a1   : > { %2429 = dma.done.wait (!%p1865_p12), %s1361_s28, 256  }
 0x3a2   : > { %2431 = vsyncadd (!%p1865_p12), %s1361_s28, 4294967040  ;;  %s40_s27 = sadd.s32 1, %s2486_s27   ;;  %s3457_s13 = sld [smem:[#allocation27_spill]] }
 0x3a3   : > { %p3264_p13 = scmp.ge.s32.totalorder %s40_s27, 6   ;;  %s3458_s5 = sld [smem:[#allocation28_spill]] }
 0x3a4   : > { %s3459_s9 = sld [smem:[#allocation40_spill]]  ;;  %s3460_s20 = sld [smem:[#allocation29_spill]] }
 0x3a5   : > { %s3461_s25 = sld [smem:[#allocation39_spill]]  ;;  %s3462_s23 = sld [smem:[#allocation32_spill]] }
 0x3a6   : > { %s3463_s24 = sld [smem:[#allocation33_spill]]  ;;  %s3464_s1 = sld [smem:[#allocation36_spill]] }
 0x3a7   : > { %s3465_s26 = sld [smem:[#allocation38_spill]]  ;;  %s3467_s15 = smov %s2438_s16 }
 0x3a8   : > { %s3468_s16 = smov %s2442_s17  ;;  %s3469_s17 = smov %s2926_s19 }
 0x3a9   : > { %s3470_s18 = smov %s3457_s13  ;;  %s3472_s21 = smov %s2466_s22 }
 0x3aa   : > { %s3471_s19 = smov %s3459_s9  ;;  %39 = sbr.rel (!%p3264_p13) target bundleno = 30 (0x1e), region = 201 }
 0x3ab   : > { %s3473_s22 = smov %s3461_s25 }
 0x3ac   : > { %s3474_s25 = smov %s3464_s1 }
 0x3b1   :  { %1375 = vsyncpa [#allocation4], 1 }
 0x3b2   :  { %1377 = vsyncpa [#allocation4 + $0x1], 1 }
 0x3b3   :  { %1378 = vsyncpa [#allocation7], 1 }
 0x3b4   :  { %1380 = vsyncpa [#allocation7 + $0x1], 1 }
 0x3b5   :  { %1381 = vsyncpa [#allocation10], 1 }
 0x3b6   :  { %1383 = vsyncpa [#allocation10 + $0x1], 1 }
 0x3b7   :  { %1384 = vsyncpa [#allocation13], 1 }
 0x3b8   :  { %1386 = vsyncpa [#allocation13 + $0x1], 1 }
 0x3b9   :  { %1387 = vsyncpa [#allocation5], 1 }
 0x3ba   :  { %1389 = vsyncpa [#allocation5 + $0x1], 1 }
 0x3bb   :  { %1390 = vsyncpa [#allocation17], 1 }
 0x3bc   :  { %1392 = vsyncpa [#allocation17 + $0x1], 1 }

</bundles_post_ra>
